<compile_context>
chip_gen: v7x
topology: tpu7x:2x2x1
jax: 0.10.0
libtpu: 0.0.40
codegen_flags: <defaults>
</compile_context>

<pallas_src>
import functools

import jax
import jax.numpy as jnp
from jax.experimental import pallas as pl
from jax.experimental.pallas import tpu as pltpu


# ------------------------------- kernel ------------------------------------ #

def videoreg_kernel(T, B,
                    x_ref,
                    fwih_ref, fwhh_ref, fb_ref,
                    bwih_ref, bwhh_ref, bb_ref,
                    w1f_ref, w1b_ref, b1_ref, w2_ref, b2_ref,
                    wl_ref, bl_ref,
                    out_ref,
                    fwd_buf, bwd_buf):
    """Fused bi-LSTM + MLP(relu, relu) + Linear.

    x_ref    : (T*B, nx)       input features (flattened seq-major)
    fwd_buf  : (T*B, H) VMEM   forward-direction hidden states
    bwd_buf  : (T*B, H) VMEM   backward-direction hidden states
    out_ref  : (T*B, out_dim)
    """
    H = fwhh_ref.shape[0]

    x = x_ref[...]                                        # (T*B, nx)

    # Hoisted input-to-hidden projections: one big matmul per direction over
    # all T*B rows.  Biases (b_ih + b_hh) are pre-folded into fb / bb, so the
    # recurrence below is bias-free.
    gi_f = (jnp.dot(x, fwih_ref[...], preferred_element_type=jnp.float32)
            + fb_ref[...])                                # (T*B, 4H)
    gi_b = (jnp.dot(x, bwih_ref[...], preferred_element_type=jnp.float32)
            + bb_ref[...])                                # (T*B, 4H)

    def lstm_step(gi_t, h, c, whh):
        # PyTorch LSTMCell gate order: i, f, g, o
        gates = gi_t + jnp.dot(h, whh, preferred_element_type=jnp.float32)
        i = jax.nn.sigmoid(gates[:, 0 * H:1 * H])
        f = jax.nn.sigmoid(gates[:, 1 * H:2 * H])
        g = jnp.tanh(gates[:, 2 * H:3 * H])
        o = jax.nn.sigmoid(gates[:, 3 * H:4 * H])
        c_new = f * c + i * g
        h_new = o * jnp.tanh(c_new)
        return h_new, c_new

    zeros = jnp.zeros((B, H), jnp.float32)

    # Forward direction (fully unrolled; T is static so all indices are static).
    fwhh = fwhh_ref[...]
    h, c = zeros, zeros
    for t in range(T):
        h, c = lstm_step(gi_f[t * B:(t + 1) * B, :], h, c, fwhh)
        fwd_buf[t * B:(t + 1) * B, :] = h

    # Backward direction (output at position t is the hidden state produced
    # when the backward LSTM consumed x[t], matching RNN.batch_forward).
    bwhh = bwhh_ref[...]
    h, c = zeros, zeros
    for t in range(T - 1, -1, -1):
        h, c = lstm_step(gi_b[t * B:(t + 1) * B, :], h, c, bwhh)
        bwd_buf[t * B:(t + 1) * B, :] = h

    # MLP (relu, relu) + final linear, batched over all T*B rows at once.
    # relu(concat([fwd, bwd], -1) @ W1 + b1) == relu(fwd @ W1_f + bwd @ W1_b + b1)
    h1 = jax.nn.relu(
        jnp.dot(fwd_buf[...], w1f_ref[...], preferred_element_type=jnp.float32)
        + jnp.dot(bwd_buf[...], w1b_ref[...], preferred_element_type=jnp.float32)
        + b1_ref[...])
    h2 = jax.nn.relu(jnp.dot(h1, w2_ref[...],
                             preferred_element_type=jnp.float32) + b2_ref[...])
    out_ref[...] = (jnp.dot(h2, wl_ref[...],
                            preferred_element_type=jnp.float32) + bl_ref[...])


# ------------------------------- wrapper ------------------------------------ #

@jax.jit
def videoregnet_forward(x, params):
    """x: (T, B, cnn_fdim) features (no_cnn path).  Returns (T*B, out_dim)."""
    T, B, nx = x.shape
    p = params
    H = p["f_whh"].shape[0]          # v_hdim // 2
    out_dim = p["l_w"].shape[1]
    f32 = jnp.float32

    x_flat = x.reshape(T * B, nx)    # contiguous metadata reshape in XLA

    # Host-side parameter plumbing (done once per call, negligible cost):
    #  * fold the two LSTM biases so the kernel recurrence is bias-free,
    #  * split the first MLP weight so the bi-dir concat is never materialized.
    f_b = p["f_bih"] + p["f_bhh"]
    b_b = p["b_bih"] + p["b_bhh"]
    w1_f = p["m_w1"][:H, :]
    w1_b = p["m_w1"][H:, :]

    vmem = pltpu.MemorySpace.VMEM
    inputs = (
        x_flat,
        p["f_wih"], p["f_whh"], f_b,
        p["b_wih"], p["b_whh"], b_b,
        w1_f, w1_b, p["m_b1"], p["m_w2"], p["m_b2"],
        p["l_w"], p["l_b"],
    )

    out = pl.pallas_call(
        functools.partial(videoreg_kernel, T, B),
        out_shape=jax.ShapeDtypeStruct((T * B, out_dim), f32),
        in_specs=[pl.BlockSpec(memory_space=vmem)] * len(inputs),
        out_specs=pl.BlockSpec(memory_space=vmem),
        scratch_shapes=[pltpu.VMEM((T * B, H), f32),   # fwd hidden slab
                        pltpu.VMEM((T * B, H), f32)],  # bwd hidden slab
    )(*inputs)
    return out


# --------------------------- pure-JAX reference ------------------------------ #

def reference_forward(x, p):
    """Numerically equivalent plain-JAX forward (mirrors the PyTorch module)."""
    T, B, _ = x.shape
    H = p["f_whh"].shape[0]

    def run_dir(wih, whh, bias, reverse):
        h = jnp.zeros((B, H), jnp.float32)
        c = jnp.zeros((B, H), jnp.float32)
        outs = [None] * T
        order = range(T - 1, -1, -1) if reverse else range(T)
        for t in order:
            gates = x[t] @ wih + h @ whh + bias
            i = jax.nn.sigmoid(gates[:, 0 * H:1 * H])
            f = jax.nn.sigmoid(gates[:, 1 * H:2 * H])
            g = jnp.tanh(gates[:, 2 * H:3 * H])
            o = jax.nn.sigmoid(gates[:, 3 * H:4 * H])
            c = f * c + i * g
            h = o * jnp.tanh(c)
            outs[t] = h
        return jnp.stack(outs, 0)                       # (T, B, H)

    fwd = run_dir(p["f_wih"], p["f_whh"], p["f_bih"] + p["f_bhh"], False)
    bwd = run_dir(p["b_wih"], p["b_whh"], p["b_bih"] + p["b_bhh"], True)
    v = jnp.concatenate([fwd, bwd], axis=2).reshape(T * B, 2 * H)
    h1 = jax.nn.relu(v @ p["m_w1"] + p["m_b1"])
    h2 = jax.nn.relu(h1 @ p["m_w2"] + p["m_b2"])
    return h2 @ p["l_w"] + p["l_b"]


# --------------------------- deterministic params --------------------------- #

def init_params(key, cnn_fdim, v_hdim, mlp_dim, out_dim):
    """PyTorch-style uniform(-1/sqrt(fan), 1/sqrt(fan)) init, weights stored
    as (in, out).  LSTMCell params use fan = hidden_size (PyTorch default)."""
    assert v_hdim % 2 == 0
    H = v_hdim // 2
    nh1, nh2 = mlp_dim
    names_shapes_fans = [
        # forward LSTMCell(cnn_fdim, H): gate order (i, f, g, o) along last dim
        ("f_wih", (cnn_fdim, 4 * H), H), ("f_whh", (H, 4 * H), H),
        ("f_bih", (1, 4 * H), H),        ("f_bhh", (1, 4 * H), H),
        # backward LSTMCell(cnn_fdim, H)
        ("b_wih", (cnn_fdim, 4 * H), H), ("b_whh", (H, 4 * H), H),
        ("b_bih", (1, 4 * H), H),        ("b_bhh", (1, 4 * H), H),
        # MLP (relu): v_hdim -> nh1 -> nh2
        ("m_w1", (v_hdim, nh1), v_hdim), ("m_b1", (1, nh1), v_hdim),
        ("m_w2", (nh1, nh2), nh1),       ("m_b2", (1, nh2), nh1),
        # final linear: nh2 -> out_dim
        ("l_w", (nh2, out_dim), nh2),    ("l_b", (1, out_dim), nh2),
    ]
    params = {}
    keys = jax.random.split(key, len(names_shapes_fans))
    for k, (name, shape, fan) in zip(keys, names_shapes_fans):
        bound = 1.0 / (fan ** 0.5)
        params[name] = jax.random.uniform(
            k, shape, jnp.float32, minval=-bound, maxval=bound)
    return params


# ---------------------------------- main ------------------------------------ #

if __name__ == "__main__":
    # Small, self-consistent config (no_cnn path: x is (T, B, cnn_fdim)).
    cnn_fdim = 32       # per-frame feature dim (CNN output dim)
    v_hdim = 64         # bi-LSTM output dim (hidden per direction = 32)
    mlp_dim = (64, 48)
    out_dim = 16
    T, B = 8, 2

    key = jax.random.PRNGKey(0)
    k_x, k_p = jax.random.split(key)
    x = jax.random.normal(k_x, (T, B, cnn_fdim), dtype=jnp.float32)
    params = init_params(k_p, cnn_fdim, v_hdim, mlp_dim, out_dim)

    y = videoregnet_forward(x, params)
    jax.block_until_ready(y)

    assert y.shape == (T * B, out_dim)
    assert bool(jnp.all(jnp.isfinite(y)))

    # Correctness check against a plain-JAX reference of the same module.
    y_ref = reference_forward(x, params)
    assert bool(jnp.allclose(y, y_ref, atol=1e-3, rtol=1e-3)), \
        f"max abs err {float(jnp.max(jnp.abs(y - y_ref)))}"

    print("KERNEL_OK")
</pallas_src>

<mosaic_0001>
module attributes {stable_mosaic.version = 11 : i64} {
  func.func @videoreg_kernel(%arg0: memref<16x32xf32, #tpu.memory_space<vmem>>, %arg1: memref<32x128xf32, #tpu.memory_space<vmem>>, %arg2: memref<32x128xf32, #tpu.memory_space<vmem>>, %arg3: memref<1x128xf32, #tpu.memory_space<vmem>>, %arg4: memref<32x128xf32, #tpu.memory_space<vmem>>, %arg5: memref<32x128xf32, #tpu.memory_space<vmem>>, %arg6: memref<1x128xf32, #tpu.memory_space<vmem>>, %arg7: memref<32x64xf32, #tpu.memory_space<vmem>>, %arg8: memref<32x64xf32, #tpu.memory_space<vmem>>, %arg9: memref<1x64xf32, #tpu.memory_space<vmem>>, %arg10: memref<64x48xf32, #tpu.memory_space<vmem>>, %arg11: memref<1x48xf32, #tpu.memory_space<vmem>>, %arg12: memref<48x16xf32, #tpu.memory_space<vmem>>, %arg13: memref<1x16xf32, #tpu.memory_space<vmem>>, %arg14: memref<16x16xf32, #tpu.memory_space<vmem>>, %arg15: memref<16x32xf32, #tpu.memory_space<vmem>>, %arg16: memref<16x32xf32, #tpu.memory_space<vmem>>) attributes {dimension_semantics = [], scalar_prefetch = 0 : i64, scratch_operands = 2 : i64, tpu.core_type = #tpu.core_type<tc>} {
    %c0 = arith.constant 0 : index
    %c0_0 = arith.constant 0 : index
    %0 = vector.load %arg0[%c0, %c0_0] : memref<16x32xf32, #tpu.memory_space<vmem>>, vector<16x32xf32>
    %c0_1 = arith.constant 0 : index
    %c0_2 = arith.constant 0 : index
    %1 = vector.load %arg1[%c0_1, %c0_2] : memref<32x128xf32, #tpu.memory_space<vmem>>, vector<32x128xf32>
    %cst = arith.constant dense<0.000000e+00> : vector<16x128xf32>
    %2 = tpu.matmul %0, %1, %cst {dimension_numbers = #tpu.dot_dimension_numbers<[1], [0], [0], [1], [0, 0, 1, 1], [], []>} : vector<16x32xf32>, vector<32x128xf32>, vector<16x128xf32> -> vector<16x128xf32>
    %c0_3 = arith.constant 0 : index
    %c0_4 = arith.constant 0 : index
    %3 = vector.load %arg3[%c0_3, %c0_4] : memref<1x128xf32, #tpu.memory_space<vmem>>, vector<1x128xf32>
    %4 = vector.broadcast %3 : vector<1x128xf32> to vector<16x128xf32>
    %5 = arith.addf %2, %4 : vector<16x128xf32>
    %c0_5 = arith.constant 0 : index
    %c0_6 = arith.constant 0 : index
    %6 = vector.load %arg4[%c0_5, %c0_6] : memref<32x128xf32, #tpu.memory_space<vmem>>, vector<32x128xf32>
    %cst_7 = arith.constant dense<0.000000e+00> : vector<16x128xf32>
    %7 = tpu.matmul %0, %6, %cst_7 {dimension_numbers = #tpu.dot_dimension_numbers<[1], [0], [0], [1], [0, 0, 1, 1], [], []>} : vector<16x32xf32>, vector<32x128xf32>, vector<16x128xf32> -> vector<16x128xf32>
    %c0_8 = arith.constant 0 : index
    %c0_9 = arith.constant 0 : index
    %8 = vector.load %arg6[%c0_8, %c0_9] : memref<1x128xf32, #tpu.memory_space<vmem>>, vector<1x128xf32>
    %9 = vector.broadcast %8 : vector<1x128xf32> to vector<16x128xf32>
    %10 = arith.addf %7, %9 : vector<16x128xf32>
    %cst_10 = arith.constant 0.000000e+00 : f32
    %11 = vector.broadcast %cst_10 : f32 to vector<2x32xf32>
    %c0_11 = arith.constant 0 : index
    %c0_12 = arith.constant 0 : index
    %12 = vector.load %arg2[%c0_11, %c0_12] : memref<32x128xf32, #tpu.memory_space<vmem>>, vector<32x128xf32>
    %13 = vector.extract_strided_slice %5 {offsets = [0, 0], sizes = [2, 128], strides = [1, 1]} : vector<16x128xf32> to vector<2x128xf32>
    %cst_13 = arith.constant dense<0.000000e+00> : vector<2x128xf32>
    %14 = tpu.matmul %11, %12, %cst_13 {dimension_numbers = #tpu.dot_dimension_numbers<[1], [0], [0], [1], [0, 0, 1, 1], [], []>} : vector<2x32xf32>, vector<32x128xf32>, vector<2x128xf32> -> vector<2x128xf32>
    %15 = arith.addf %13, %14 : vector<2x128xf32>
    %16 = vector.extract_strided_slice %15 {offsets = [0, 0], sizes = [2, 32], strides = [1, 1]} : vector<2x128xf32> to vector<2x32xf32>
    %17 = arith.negf %16 : vector<2x32xf32>
    %18 = math.exp %17 : vector<2x32xf32>
    %cst_14 = arith.constant 1.000000e+00 : f32
    %19 = vector.broadcast %cst_14 : f32 to vector<2x32xf32>
    %20 = arith.addf %19, %18 : vector<2x32xf32>
    %21 = arith.divf %19, %20 : vector<2x32xf32>
    %22 = vector.extract_strided_slice %15 {offsets = [0, 32], sizes = [2, 32], strides = [1, 1]} : vector<2x128xf32> to vector<2x32xf32>
    %23 = arith.negf %22 : vector<2x32xf32>
    %24 = math.exp %23 : vector<2x32xf32>
    %cst_15 = arith.constant 1.000000e+00 : f32
    %25 = vector.broadcast %cst_15 : f32 to vector<2x32xf32>
    %26 = arith.addf %25, %24 : vector<2x32xf32>
    %27 = arith.divf %25, %26 : vector<2x32xf32>
    %28 = vector.extract_strided_slice %15 {offsets = [0, 64], sizes = [2, 32], strides = [1, 1]} : vector<2x128xf32> to vector<2x32xf32>
    %29 = math.tanh %28 : vector<2x32xf32>
    %30 = vector.extract_strided_slice %15 {offsets = [0, 96], sizes = [2, 32], strides = [1, 1]} : vector<2x128xf32> to vector<2x32xf32>
    %31 = arith.negf %30 : vector<2x32xf32>
    %32 = math.exp %31 : vector<2x32xf32>
    %cst_16 = arith.constant 1.000000e+00 : f32
    %33 = vector.broadcast %cst_16 : f32 to vector<2x32xf32>
    %34 = arith.addf %33, %32 : vector<2x32xf32>
    %35 = arith.divf %33, %34 : vector<2x32xf32>
    %36 = arith.mulf %27, %11 : vector<2x32xf32>
    %37 = arith.mulf %21, %29 : vector<2x32xf32>
    %38 = arith.addf %36, %37 : vector<2x32xf32>
    %39 = math.tanh %38 : vector<2x32xf32>
    %40 = arith.mulf %35, %39 : vector<2x32xf32>
    %c0_17 = arith.constant 0 : index
    %c0_18 = arith.constant 0 : index
    %41 = vector.load %arg15[%c0_17, %c0_18] : memref<16x32xf32, #tpu.memory_space<vmem>>, vector<2x32xf32>
    tpu.vector_store %arg15[%c0_17, %c0_18], %40 {strides = array<i32>} : memref<16x32xf32, #tpu.memory_space<vmem>>, vector<2x32xf32>,
    %42 = vector.extract_strided_slice %5 {offsets = [2, 0], sizes = [2, 128], strides = [1, 1]} : vector<16x128xf32> to vector<2x128xf32>
    %cst_19 = arith.constant dense<0.000000e+00> : vector<2x128xf32>
    %43 = tpu.matmul %40, %12, %cst_19 {dimension_numbers = #tpu.dot_dimension_numbers<[1], [0], [0], [1], [0, 0, 1, 1], [], []>} : vector<2x32xf32>, vector<32x128xf32>, vector<2x128xf32> -> vector<2x128xf32>
    %44 = arith.addf %42, %43 : vector<2x128xf32>
    %45 = vector.extract_strided_slice %44 {offsets = [0, 0], sizes = [2, 32], strides = [1, 1]} : vector<2x128xf32> to vector<2x32xf32>
    %46 = arith.negf %45 : vector<2x32xf32>
    %47 = math.exp %46 : vector<2x32xf32>
    %cst_20 = arith.constant 1.000000e+00 : f32
    %48 = vector.broadcast %cst_20 : f32 to vector<2x32xf32>
    %49 = arith.addf %48, %47 : vector<2x32xf32>
    %50 = arith.divf %48, %49 : vector<2x32xf32>
    %51 = vector.extract_strided_slice %44 {offsets = [0, 32], sizes = [2, 32], strides = [1, 1]} : vector<2x128xf32> to vector<2x32xf32>
    %52 = arith.negf %51 : vector<2x32xf32>
    %53 = math.exp %52 : vector<2x32xf32>
    %cst_21 = arith.constant 1.000000e+00 : f32
    %54 = vector.broadcast %cst_21 : f32 to vector<2x32xf32>
    %55 = arith.addf %54, %53 : vector<2x32xf32>
    %56 = arith.divf %54, %55 : vector<2x32xf32>
    %57 = vector.extract_strided_slice %44 {offsets = [0, 64], sizes = [2, 32], strides = [1, 1]} : vector<2x128xf32> to vector<2x32xf32>
    %58 = math.tanh %57 : vector<2x32xf32>
    %59 = vector.extract_strided_slice %44 {offsets = [0, 96], sizes = [2, 32], strides = [1, 1]} : vector<2x128xf32> to vector<2x32xf32>
    %60 = arith.negf %59 : vector<2x32xf32>
    %61 = math.exp %60 : vector<2x32xf32>
    %cst_22 = arith.constant 1.000000e+00 : f32
    %62 = vector.broadcast %cst_22 : f32 to vector<2x32xf32>
    %63 = arith.addf %62, %61 : vector<2x32xf32>
    %64 = arith.divf %62, %63 : vector<2x32xf32>
    %65 = arith.mulf %56, %38 : vector<2x32xf32>
    %66 = arith.mulf %50, %58 : vector<2x32xf32>
    %67 = arith.addf %65, %66 : vector<2x32xf32>
    %68 = math.tanh %67 : vector<2x32xf32>
    %69 = arith.mulf %64, %68 : vector<2x32xf32>
    %c2 = arith.constant 2 : index
    %c0_23 = arith.constant 0 : index
    %70 = vector.load %arg15[%c2, %c0_23] : memref<16x32xf32, #tpu.memory_space<vmem>>, vector<2x32xf32>
    tpu.vector_store %arg15[%c2, %c0_23], %69 {strides = array<i32>} : memref<16x32xf32, #tpu.memory_space<vmem>>, vector<2x32xf32>,
    %71 = vector.extract_strided_slice %5 {offsets = [4, 0], sizes = [2, 128], strides = [1, 1]} : vector<16x128xf32> to vector<2x128xf32>
    %cst_24 = arith.constant dense<0.000000e+00> : vector<2x128xf32>
    %72 = tpu.matmul %69, %12, %cst_24 {dimension_numbers = #tpu.dot_dimension_numbers<[1], [0], [0], [1], [0, 0, 1, 1], [], []>} : vector<2x32xf32>, vector<32x128xf32>, vector<2x128xf32> -> vector<2x128xf32>
    %73 = arith.addf %71, %72 : vector<2x128xf32>
    %74 = vector.extract_strided_slice %73 {offsets = [0, 0], sizes = [2, 32], strides = [1, 1]} : vector<2x128xf32> to vector<2x32xf32>
    %75 = arith.negf %74 : vector<2x32xf32>
    %76 = math.exp %75 : vector<2x32xf32>
    %cst_25 = arith.constant 1.000000e+00 : f32
    %77 = vector.broadcast %cst_25 : f32 to vector<2x32xf32>
    %78 = arith.addf %77, %76 : vector<2x32xf32>
    %79 = arith.divf %77, %78 : vector<2x32xf32>
    %80 = vector.extract_strided_slice %73 {offsets = [0, 32], sizes = [2, 32], strides = [1, 1]} : vector<2x128xf32> to vector<2x32xf32>
    %81 = arith.negf %80 : vector<2x32xf32>
    %82 = math.exp %81 : vector<2x32xf32>
    %cst_26 = arith.constant 1.000000e+00 : f32
    %83 = vector.broadcast %cst_26 : f32 to vector<2x32xf32>
    %84 = arith.addf %83, %82 : vector<2x32xf32>
    %85 = arith.divf %83, %84 : vector<2x32xf32>
    %86 = vector.extract_strided_slice %73 {offsets = [0, 64], sizes = [2, 32], strides = [1, 1]} : vector<2x128xf32> to vector<2x32xf32>
    %87 = math.tanh %86 : vector<2x32xf32>
    %88 = vector.extract_strided_slice %73 {offsets = [0, 96], sizes = [2, 32], strides = [1, 1]} : vector<2x128xf32> to vector<2x32xf32>
    %89 = arith.negf %88 : vector<2x32xf32>
    %90 = math.exp %89 : vector<2x32xf32>
    %cst_27 = arith.constant 1.000000e+00 : f32
    %91 = vector.broadcast %cst_27 : f32 to vector<2x32xf32>
    %92 = arith.addf %91, %90 : vector<2x32xf32>
    %93 = arith.divf %91, %92 : vector<2x32xf32>
    %94 = arith.mulf %85, %67 : vector<2x32xf32>
    %95 = arith.mulf %79, %87 : vector<2x32xf32>
    %96 = arith.addf %94, %95 : vector<2x32xf32>
    %97 = math.tanh %96 : vector<2x32xf32>
    %98 = arith.mulf %93, %97 : vector<2x32xf32>
    %c4 = arith.constant 4 : index
    %c0_28 = arith.constant 0 : index
    %99 = vector.load %arg15[%c4, %c0_28] : memref<16x32xf32, #tpu.memory_space<vmem>>, vector<2x32xf32>
    tpu.vector_store %arg15[%c4, %c0_28], %98 {strides = array<i32>} : memref<16x32xf32, #tpu.memory_space<vmem>>, vector<2x32xf32>,
    %100 = vector.extract_strided_slice %5 {offsets = [6, 0], sizes = [2, 128], strides = [1, 1]} : vector<16x128xf32> to vector<2x128xf32>
    %cst_29 = arith.constant dense<0.000000e+00> : vector<2x128xf32>
    %101 = tpu.matmul %98, %12, %cst_29 {dimension_numbers = #tpu.dot_dimension_numbers<[1], [0], [0], [1], [0, 0, 1, 1], [], []>} : vector<2x32xf32>, vector<32x128xf32>, vector<2x128xf32> -> vector<2x128xf32>
    %102 = arith.addf %100, %101 : vector<2x128xf32>
    %103 = vector.extract_strided_slice %102 {offsets = [0, 0], sizes = [2, 32], strides = [1, 1]} : vector<2x128xf32> to vector<2x32xf32>
    %104 = arith.negf %103 : vector<2x32xf32>
    %105 = math.exp %104 : vector<2x32xf32>
    %cst_30 = arith.constant 1.000000e+00 : f32
    %106 = vector.broadcast %cst_30 : f32 to vector<2x32xf32>
    %107 = arith.addf %106, %105 : vector<2x32xf32>
    %108 = arith.divf %106, %107 : vector<2x32xf32>
    %109 = vector.extract_strided_slice %102 {offsets = [0, 32], sizes = [2, 32], strides = [1, 1]} : vector<2x128xf32> to vector<2x32xf32>
    %110 = arith.negf %109 : vector<2x32xf32>
    %111 = math.exp %110 : vector<2x32xf32>
    %cst_31 = arith.constant 1.000000e+00 : f32
    %112 = vector.broadcast %cst_31 : f32 to vector<2x32xf32>
    %113 = arith.addf %112, %111 : vector<2x32xf32>
    %114 = arith.divf %112, %113 : vector<2x32xf32>
    %115 = vector.extract_strided_slice %102 {offsets = [0, 64], sizes = [2, 32], strides = [1, 1]} : vector<2x128xf32> to vector<2x32xf32>
    %116 = math.tanh %115 : vector<2x32xf32>
    %117 = vector.extract_strided_slice %102 {offsets = [0, 96], sizes = [2, 32], strides = [1, 1]} : vector<2x128xf32> to vector<2x32xf32>
    %118 = arith.negf %117 : vector<2x32xf32>
    %119 = math.exp %118 : vector<2x32xf32>
    %cst_32 = arith.constant 1.000000e+00 : f32
    %120 = vector.broadcast %cst_32 : f32 to vector<2x32xf32>
    %121 = arith.addf %120, %119 : vector<2x32xf32>
    %122 = arith.divf %120, %121 : vector<2x32xf32>
    %123 = arith.mulf %114, %96 : vector<2x32xf32>
    %124 = arith.mulf %108, %116 : vector<2x32xf32>
    %125 = arith.addf %123, %124 : vector<2x32xf32>
    %126 = math.tanh %125 : vector<2x32xf32>
    %127 = arith.mulf %122, %126 : vector<2x32xf32>
    %c6 = arith.constant 6 : index
    %c0_33 = arith.constant 0 : index
    %128 = vector.load %arg15[%c6, %c0_33] : memref<16x32xf32, #tpu.memory_space<vmem>>, vector<2x32xf32>
    tpu.vector_store %arg15[%c6, %c0_33], %127 {strides = array<i32>} : memref<16x32xf32, #tpu.memory_space<vmem>>, vector<2x32xf32>,
    %129 = vector.extract_strided_slice %5 {offsets = [8, 0], sizes = [2, 128], strides = [1, 1]} : vector<16x128xf32> to vector<2x128xf32>
    %cst_34 = arith.constant dense<0.000000e+00> : vector<2x128xf32>
    %130 = tpu.matmul %127, %12, %cst_34 {dimension_numbers = #tpu.dot_dimension_numbers<[1], [0], [0], [1], [0, 0, 1, 1], [], []>} : vector<2x32xf32>, vector<32x128xf32>, vector<2x128xf32> -> vector<2x128xf32>
    %131 = arith.addf %129, %130 : vector<2x128xf32>
    %132 = vector.extract_strided_slice %131 {offsets = [0, 0], sizes = [2, 32], strides = [1, 1]} : vector<2x128xf32> to vector<2x32xf32>
    %133 = arith.negf %132 : vector<2x32xf32>
    %134 = math.exp %133 : vector<2x32xf32>
    %cst_35 = arith.constant 1.000000e+00 : f32
    %135 = vector.broadcast %cst_35 : f32 to vector<2x32xf32>
    %136 = arith.addf %135, %134 : vector<2x32xf32>
    %137 = arith.divf %135, %136 : vector<2x32xf32>
    %138 = vector.extract_strided_slice %131 {offsets = [0, 32], sizes = [2, 32], strides = [1, 1]} : vector<2x128xf32> to vector<2x32xf32>
    %139 = arith.negf %138 : vector<2x32xf32>
    %140 = math.exp %139 : vector<2x32xf32>
    %cst_36 = arith.constant 1.000000e+00 : f32
    %141 = vector.broadcast %cst_36 : f32 to vector<2x32xf32>
    %142 = arith.addf %141, %140 : vector<2x32xf32>
    %143 = arith.divf %141, %142 : vector<2x32xf32>
    %144 = vector.extract_strided_slice %131 {offsets = [0, 64], sizes = [2, 32], strides = [1, 1]} : vector<2x128xf32> to vector<2x32xf32>
    %145 = math.tanh %144 : vector<2x32xf32>
    %146 = vector.extract_strided_slice %131 {offsets = [0, 96], sizes = [2, 32], strides = [1, 1]} : vector<2x128xf32> to vector<2x32xf32>
    %147 = arith.negf %146 : vector<2x32xf32>
    %148 = math.exp %147 : vector<2x32xf32>
    %cst_37 = arith.constant 1.000000e+00 : f32
    %149 = vector.broadcast %cst_37 : f32 to vector<2x32xf32>
    %150 = arith.addf %149, %148 : vector<2x32xf32>
    %151 = arith.divf %149, %150 : vector<2x32xf32>
    %152 = arith.mulf %143, %125 : vector<2x32xf32>
    %153 = arith.mulf %137, %145 : vector<2x32xf32>
    %154 = arith.addf %152, %153 : vector<2x32xf32>
    %155 = math.tanh %154 : vector<2x32xf32>
    %156 = arith.mulf %151, %155 : vector<2x32xf32>
    %c8 = arith.constant 8 : index
    %c0_38 = arith.constant 0 : index
    %157 = vector.load %arg15[%c8, %c0_38] : memref<16x32xf32, #tpu.memory_space<vmem>>, vector<2x32xf32>
    tpu.vector_store %arg15[%c8, %c0_38], %156 {strides = array<i32>} : memref<16x32xf32, #tpu.memory_space<vmem>>, vector<2x32xf32>,
    %158 = vector.extract_strided_slice %5 {offsets = [10, 0], sizes = [2, 128], strides = [1, 1]} : vector<16x128xf32> to vector<2x128xf32>
    %cst_39 = arith.constant dense<0.000000e+00> : vector<2x128xf32>
    %159 = tpu.matmul %156, %12, %cst_39 {dimension_numbers = #tpu.dot_dimension_numbers<[1], [0], [0], [1], [0, 0, 1, 1], [], []>} : vector<2x32xf32>, vector<32x128xf32>, vector<2x128xf32> -> vector<2x128xf32>
    %160 = arith.addf %158, %159 : vector<2x128xf32>
    %161 = vector.extract_strided_slice %160 {offsets = [0, 0], sizes = [2, 32], strides = [1, 1]} : vector<2x128xf32> to vector<2x32xf32>
    %162 = arith.negf %161 : vector<2x32xf32>
    %163 = math.exp %162 : vector<2x32xf32>
    %cst_40 = arith.constant 1.000000e+00 : f32
    %164 = vector.broadcast %cst_40 : f32 to vector<2x32xf32>
    %165 = arith.addf %164, %163 : vector<2x32xf32>
    %166 = arith.divf %164, %165 : vector<2x32xf32>
    %167 = vector.extract_strided_slice %160 {offsets = [0, 32], sizes = [2, 32], strides = [1, 1]} : vector<2x128xf32> to vector<2x32xf32>
    %168 = arith.negf %167 : vector<2x32xf32>
    %169 = math.exp %168 : vector<2x32xf32>
    %cst_41 = arith.constant 1.000000e+00 : f32
    %170 = vector.broadcast %cst_41 : f32 to vector<2x32xf32>
    %171 = arith.addf %170, %169 : vector<2x32xf32>
    %172 = arith.divf %170, %171 : vector<2x32xf32>
    %173 = vector.extract_strided_slice %160 {offsets = [0, 64], sizes = [2, 32], strides = [1, 1]} : vector<2x128xf32> to vector<2x32xf32>
    %174 = math.tanh %173 : vector<2x32xf32>
    %175 = vector.extract_strided_slice %160 {offsets = [0, 96], sizes = [2, 32], strides = [1, 1]} : vector<2x128xf32> to vector<2x32xf32>
    %176 = arith.negf %175 : vector<2x32xf32>
    %177 = math.exp %176 : vector<2x32xf32>
    %cst_42 = arith.constant 1.000000e+00 : f32
    %178 = vector.broadcast %cst_42 : f32 to vector<2x32xf32>
    %179 = arith.addf %178, %177 : vector<2x32xf32>
    %180 = arith.divf %178, %179 : vector<2x32xf32>
    %181 = arith.mulf %172, %154 : vector<2x32xf32>
    %182 = arith.mulf %166, %174 : vector<2x32xf32>
    %183 = arith.addf %181, %182 : vector<2x32xf32>
    %184 = math.tanh %183 : vector<2x32xf32>
    %185 = arith.mulf %180, %184 : vector<2x32xf32>
    %c10 = arith.constant 10 : index
    %c0_43 = arith.constant 0 : index
    %186 = vector.load %arg15[%c10, %c0_43] : memref<16x32xf32, #tpu.memory_space<vmem>>, vector<2x32xf32>
    tpu.vector_store %arg15[%c10, %c0_43], %185 {strides = array<i32>} : memref<16x32xf32, #tpu.memory_space<vmem>>, vector<2x32xf32>,
    %187 = vector.extract_strided_slice %5 {offsets = [12, 0], sizes = [2, 128], strides = [1, 1]} : vector<16x128xf32> to vector<2x128xf32>
    %cst_44 = arith.constant dense<0.000000e+00> : vector<2x128xf32>
    %188 = tpu.matmul %185, %12, %cst_44 {dimension_numbers = #tpu.dot_dimension_numbers<[1], [0], [0], [1], [0, 0, 1, 1], [], []>} : vector<2x32xf32>, vector<32x128xf32>, vector<2x128xf32> -> vector<2x128xf32>
    %189 = arith.addf %187, %188 : vector<2x128xf32>
    %190 = vector.extract_strided_slice %189 {offsets = [0, 0], sizes = [2, 32], strides = [1, 1]} : vector<2x128xf32> to vector<2x32xf32>
    %191 = arith.negf %190 : vector<2x32xf32>
    %192 = math.exp %191 : vector<2x32xf32>
    %cst_45 = arith.constant 1.000000e+00 : f32
    %193 = vector.broadcast %cst_45 : f32 to vector<2x32xf32>
    %194 = arith.addf %193, %192 : vector<2x32xf32>
    %195 = arith.divf %193, %194 : vector<2x32xf32>
    %196 = vector.extract_strided_slice %189 {offsets = [0, 32], sizes = [2, 32], strides = [1, 1]} : vector<2x128xf32> to vector<2x32xf32>
    %197 = arith.negf %196 : vector<2x32xf32>
    %198 = math.exp %197 : vector<2x32xf32>
    %cst_46 = arith.constant 1.000000e+00 : f32
    %199 = vector.broadcast %cst_46 : f32 to vector<2x32xf32>
    %200 = arith.addf %199, %198 : vector<2x32xf32>
    %201 = arith.divf %199, %200 : vector<2x32xf32>
    %202 = vector.extract_strided_slice %189 {offsets = [0, 64], sizes = [2, 32], strides = [1, 1]} : vector<2x128xf32> to vector<2x32xf32>
    %203 = math.tanh %202 : vector<2x32xf32>
    %204 = vector.extract_strided_slice %189 {offsets = [0, 96], sizes = [2, 32], strides = [1, 1]} : vector<2x128xf32> to vector<2x32xf32>
    %205 = arith.negf %204 : vector<2x32xf32>
    %206 = math.exp %205 : vector<2x32xf32>
    %cst_47 = arith.constant 1.000000e+00 : f32
    %207 = vector.broadcast %cst_47 : f32 to vector<2x32xf32>
    %208 = arith.addf %207, %206 : vector<2x32xf32>
    %209 = arith.divf %207, %208 : vector<2x32xf32>
    %210 = arith.mulf %201, %183 : vector<2x32xf32>
    %211 = arith.mulf %195, %203 : vector<2x32xf32>
    %212 = arith.addf %210, %211 : vector<2x32xf32>
    %213 = math.tanh %212 : vector<2x32xf32>
    %214 = arith.mulf %209, %213 : vector<2x32xf32>
    %c12 = arith.constant 12 : index
    %c0_48 = arith.constant 0 : index
    %215 = vector.load %arg15[%c12, %c0_48] : memref<16x32xf32, #tpu.memory_space<vmem>>, vector<2x32xf32>
    tpu.vector_store %arg15[%c12, %c0_48], %214 {strides = array<i32>} : memref<16x32xf32, #tpu.memory_space<vmem>>, vector<2x32xf32>,
    %216 = vector.extract_strided_slice %5 {offsets = [14, 0], sizes = [2, 128], strides = [1, 1]} : vector<16x128xf32> to vector<2x128xf32>
    %cst_49 = arith.constant dense<0.000000e+00> : vector<2x128xf32>
    %217 = tpu.matmul %214, %12, %cst_49 {dimension_numbers = #tpu.dot_dimension_numbers<[1], [0], [0], [1], [0, 0, 1, 1], [], []>} : vector<2x32xf32>, vector<32x128xf32>, vector<2x128xf32> -> vector<2x128xf32>
    %218 = arith.addf %216, %217 : vector<2x128xf32>
    %219 = vector.extract_strided_slice %218 {offsets = [0, 0], sizes = [2, 32], strides = [1, 1]} : vector<2x128xf32> to vector<2x32xf32>
    %220 = arith.negf %219 : vector<2x32xf32>
    %221 = math.exp %220 : vector<2x32xf32>
    %cst_50 = arith.constant 1.000000e+00 : f32
    %222 = vector.broadcast %cst_50 : f32 to vector<2x32xf32>
    %223 = arith.addf %222, %221 : vector<2x32xf32>
    %224 = arith.divf %222, %223 : vector<2x32xf32>
    %225 = vector.extract_strided_slice %218 {offsets = [0, 32], sizes = [2, 32], strides = [1, 1]} : vector<2x128xf32> to vector<2x32xf32>
    %226 = arith.negf %225 : vector<2x32xf32>
    %227 = math.exp %226 : vector<2x32xf32>
    %cst_51 = arith.constant 1.000000e+00 : f32
    %228 = vector.broadcast %cst_51 : f32 to vector<2x32xf32>
    %229 = arith.addf %228, %227 : vector<2x32xf32>
    %230 = arith.divf %228, %229 : vector<2x32xf32>
    %231 = vector.extract_strided_slice %218 {offsets = [0, 64], sizes = [2, 32], strides = [1, 1]} : vector<2x128xf32> to vector<2x32xf32>
    %232 = math.tanh %231 : vector<2x32xf32>
    %233 = vector.extract_strided_slice %218 {offsets = [0, 96], sizes = [2, 32], strides = [1, 1]} : vector<2x128xf32> to vector<2x32xf32>
    %234 = arith.negf %233 : vector<2x32xf32>
    %235 = math.exp %234 : vector<2x32xf32>
    %cst_52 = arith.constant 1.000000e+00 : f32
    %236 = vector.broadcast %cst_52 : f32 to vector<2x32xf32>
    %237 = arith.addf %236, %235 : vector<2x32xf32>
    %238 = arith.divf %236, %237 : vector<2x32xf32>
    %239 = arith.mulf %230, %212 : vector<2x32xf32>
    %240 = arith.mulf %224, %232 : vector<2x32xf32>
    %241 = arith.addf %239, %240 : vector<2x32xf32>
    %242 = math.tanh %241 : vector<2x32xf32>
    %243 = arith.mulf %238, %242 : vector<2x32xf32>
    %c14 = arith.constant 14 : index
    %c0_53 = arith.constant 0 : index
    %244 = vector.load %arg15[%c14, %c0_53] : memref<16x32xf32, #tpu.memory_space<vmem>>, vector<2x32xf32>
    tpu.vector_store %arg15[%c14, %c0_53], %243 {strides = array<i32>} : memref<16x32xf32, #tpu.memory_space<vmem>>, vector<2x32xf32>,
    %c0_54 = arith.constant 0 : index
    %c0_55 = arith.constant 0 : index
    %245 = vector.load %arg5[%c0_54, %c0_55] : memref<32x128xf32, #tpu.memory_space<vmem>>, vector<32x128xf32>
    %246 = vector.extract_strided_slice %10 {offsets = [14, 0], sizes = [2, 128], strides = [1, 1]} : vector<16x128xf32> to vector<2x128xf32>
    %cst_56 = arith.constant dense<0.000000e+00> : vector<2x128xf32>
    %247 = tpu.matmul %11, %245, %cst_56 {dimension_numbers = #tpu.dot_dimension_numbers<[1], [0], [0], [1], [0, 0, 1, 1], [], []>} : vector<2x32xf32>, vector<32x128xf32>, vector<2x128xf32> -> vector<2x128xf32>
    %248 = arith.addf %246, %247 : vector<2x128xf32>
    %249 = vector.extract_strided_slice %248 {offsets = [0, 0], sizes = [2, 32], strides = [1, 1]} : vector<2x128xf32> to vector<2x32xf32>
    %250 = arith.negf %249 : vector<2x32xf32>
    %251 = math.exp %250 : vector<2x32xf32>
    %cst_57 = arith.constant 1.000000e+00 : f32
    %252 = vector.broadcast %cst_57 : f32 to vector<2x32xf32>
    %253 = arith.addf %252, %251 : vector<2x32xf32>
    %254 = arith.divf %252, %253 : vector<2x32xf32>
    %255 = vector.extract_strided_slice %248 {offsets = [0, 32], sizes = [2, 32], strides = [1, 1]} : vector<2x128xf32> to vector<2x32xf32>
    %256 = arith.negf %255 : vector<2x32xf32>
    %257 = math.exp %256 : vector<2x32xf32>
    %cst_58 = arith.constant 1.000000e+00 : f32
    %258 = vector.broadcast %cst_58 : f32 to vector<2x32xf32>
    %259 = arith.addf %258, %257 : vector<2x32xf32>
    %260 = arith.divf %258, %259 : vector<2x32xf32>
    %261 = vector.extract_strided_slice %248 {offsets = [0, 64], sizes = [2, 32], strides = [1, 1]} : vector<2x128xf32> to vector<2x32xf32>
    %262 = math.tanh %261 : vector<2x32xf32>
    %263 = vector.extract_strided_slice %248 {offsets = [0, 96], sizes = [2, 32], strides = [1, 1]} : vector<2x128xf32> to vector<2x32xf32>
    %264 = arith.negf %263 : vector<2x32xf32>
    %265 = math.exp %264 : vector<2x32xf32>
    %cst_59 = arith.constant 1.000000e+00 : f32
    %266 = vector.broadcast %cst_59 : f32 to vector<2x32xf32>
    %267 = arith.addf %266, %265 : vector<2x32xf32>
    %268 = arith.divf %266, %267 : vector<2x32xf32>
    %269 = arith.mulf %260, %11 : vector<2x32xf32>
    %270 = arith.mulf %254, %262 : vector<2x32xf32>
    %271 = arith.addf %269, %270 : vector<2x32xf32>
    %272 = math.tanh %271 : vector<2x32xf32>
    %273 = arith.mulf %268, %272 : vector<2x32xf32>
    %c14_60 = arith.constant 14 : index
    %c0_61 = arith.constant 0 : index
    %274 = vector.load %arg16[%c14_60, %c0_61] : memref<16x32xf32, #tpu.memory_space<vmem>>, vector<2x32xf32>
    tpu.vector_store %arg16[%c14_60, %c0_61], %273 {strides = array<i32>} : memref<16x32xf32, #tpu.memory_space<vmem>>, vector<2x32xf32>,
    %275 = vector.extract_strided_slice %10 {offsets = [12, 0], sizes = [2, 128], strides = [1, 1]} : vector<16x128xf32> to vector<2x128xf32>
    %cst_62 = arith.constant dense<0.000000e+00> : vector<2x128xf32>
    %276 = tpu.matmul %273, %245, %cst_62 {dimension_numbers = #tpu.dot_dimension_numbers<[1], [0], [0], [1], [0, 0, 1, 1], [], []>} : vector<2x32xf32>, vector<32x128xf32>, vector<2x128xf32> -> vector<2x128xf32>
    %277 = arith.addf %275, %276 : vector<2x128xf32>
    %278 = vector.extract_strided_slice %277 {offsets = [0, 0], sizes = [2, 32], strides = [1, 1]} : vector<2x128xf32> to vector<2x32xf32>
    %279 = arith.negf %278 : vector<2x32xf32>
    %280 = math.exp %279 : vector<2x32xf32>
    %cst_63 = arith.constant 1.000000e+00 : f32
    %281 = vector.broadcast %cst_63 : f32 to vector<2x32xf32>
    %282 = arith.addf %281, %280 : vector<2x32xf32>
    %283 = arith.divf %281, %282 : vector<2x32xf32>
    %284 = vector.extract_strided_slice %277 {offsets = [0, 32], sizes = [2, 32], strides = [1, 1]} : vector<2x128xf32> to vector<2x32xf32>
    %285 = arith.negf %284 : vector<2x32xf32>
    %286 = math.exp %285 : vector<2x32xf32>
    %cst_64 = arith.constant 1.000000e+00 : f32
    %287 = vector.broadcast %cst_64 : f32 to vector<2x32xf32>
    %288 = arith.addf %287, %286 : vector<2x32xf32>
    %289 = arith.divf %287, %288 : vector<2x32xf32>
    %290 = vector.extract_strided_slice %277 {offsets = [0, 64], sizes = [2, 32], strides = [1, 1]} : vector<2x128xf32> to vector<2x32xf32>
    %291 = math.tanh %290 : vector<2x32xf32>
    %292 = vector.extract_strided_slice %277 {offsets = [0, 96], sizes = [2, 32], strides = [1, 1]} : vector<2x128xf32> to vector<2x32xf32>
    %293 = arith.negf %292 : vector<2x32xf32>
    %294 = math.exp %293 : vector<2x32xf32>
    %cst_65 = arith.constant 1.000000e+00 : f32
    %295 = vector.broadcast %cst_65 : f32 to vector<2x32xf32>
    %296 = arith.addf %295, %294 : vector<2x32xf32>
    %297 = arith.divf %295, %296 : vector<2x32xf32>
    %298 = arith.mulf %289, %271 : vector<2x32xf32>
    %299 = arith.mulf %283, %291 : vector<2x32xf32>
    %300 = arith.addf %298, %299 : vector<2x32xf32>
    %301 = math.tanh %300 : vector<2x32xf32>
    %302 = arith.mulf %297, %301 : vector<2x32xf32>
    %c12_66 = arith.constant 12 : index
    %c0_67 = arith.constant 0 : index
    %303 = vector.load %arg16[%c12_66, %c0_67] : memref<16x32xf32, #tpu.memory_space<vmem>>, vector<2x32xf32>
    tpu.vector_store %arg16[%c12_66, %c0_67], %302 {strides = array<i32>} : memref<16x32xf32, #tpu.memory_space<vmem>>, vector<2x32xf32>,
    %304 = vector.extract_strided_slice %10 {offsets = [10, 0], sizes = [2, 128], strides = [1, 1]} : vector<16x128xf32> to vector<2x128xf32>
    %cst_68 = arith.constant dense<0.000000e+00> : vector<2x128xf32>
    %305 = tpu.matmul %302, %245, %cst_68 {dimension_numbers = #tpu.dot_dimension_numbers<[1], [0], [0], [1], [0, 0, 1, 1], [], []>} : vector<2x32xf32>, vector<32x128xf32>, vector<2x128xf32> -> vector<2x128xf32>
    %306 = arith.addf %304, %305 : vector<2x128xf32>
    %307 = vector.extract_strided_slice %306 {offsets = [0, 0], sizes = [2, 32], strides = [1, 1]} : vector<2x128xf32> to vector<2x32xf32>
    %308 = arith.negf %307 : vector<2x32xf32>
    %309 = math.exp %308 : vector<2x32xf32>
    %cst_69 = arith.constant 1.000000e+00 : f32
    %310 = vector.broadcast %cst_69 : f32 to vector<2x32xf32>
    %311 = arith.addf %310, %309 : vector<2x32xf32>
    %312 = arith.divf %310, %311 : vector<2x32xf32>
    %313 = vector.extract_strided_slice %306 {offsets = [0, 32], sizes = [2, 32], strides = [1, 1]} : vector<2x128xf32> to vector<2x32xf32>
    %314 = arith.negf %313 : vector<2x32xf32>
    %315 = math.exp %314 : vector<2x32xf32>
    %cst_70 = arith.constant 1.000000e+00 : f32
    %316 = vector.broadcast %cst_70 : f32 to vector<2x32xf32>
    %317 = arith.addf %316, %315 : vector<2x32xf32>
    %318 = arith.divf %316, %317 : vector<2x32xf32>
    %319 = vector.extract_strided_slice %306 {offsets = [0, 64], sizes = [2, 32], strides = [1, 1]} : vector<2x128xf32> to vector<2x32xf32>
    %320 = math.tanh %319 : vector<2x32xf32>
    %321 = vector.extract_strided_slice %306 {offsets = [0, 96], sizes = [2, 32], strides = [1, 1]} : vector<2x128xf32> to vector<2x32xf32>
    %322 = arith.negf %321 : vector<2x32xf32>
    %323 = math.exp %322 : vector<2x32xf32>
    %cst_71 = arith.constant 1.000000e+00 : f32
    %324 = vector.broadcast %cst_71 : f32 to vector<2x32xf32>
    %325 = arith.addf %324, %323 : vector<2x32xf32>
    %326 = arith.divf %324, %325 : vector<2x32xf32>
    %327 = arith.mulf %318, %300 : vector<2x32xf32>
    %328 = arith.mulf %312, %320 : vector<2x32xf32>
    %329 = arith.addf %327, %328 : vector<2x32xf32>
    %330 = math.tanh %329 : vector<2x32xf32>
    %331 = arith.mulf %326, %330 : vector<2x32xf32>
    %c10_72 = arith.constant 10 : index
    %c0_73 = arith.constant 0 : index
    %332 = vector.load %arg16[%c10_72, %c0_73] : memref<16x32xf32, #tpu.memory_space<vmem>>, vector<2x32xf32>
    tpu.vector_store %arg16[%c10_72, %c0_73], %331 {strides = array<i32>} : memref<16x32xf32, #tpu.memory_space<vmem>>, vector<2x32xf32>,
    %333 = vector.extract_strided_slice %10 {offsets = [8, 0], sizes = [2, 128], strides = [1, 1]} : vector<16x128xf32> to vector<2x128xf32>
    %cst_74 = arith.constant dense<0.000000e+00> : vector<2x128xf32>
    %334 = tpu.matmul %331, %245, %cst_74 {dimension_numbers = #tpu.dot_dimension_numbers<[1], [0], [0], [1], [0, 0, 1, 1], [], []>} : vector<2x32xf32>, vector<32x128xf32>, vector<2x128xf32> -> vector<2x128xf32>
    %335 = arith.addf %333, %334 : vector<2x128xf32>
    %336 = vector.extract_strided_slice %335 {offsets = [0, 0], sizes = [2, 32], strides = [1, 1]} : vector<2x128xf32> to vector<2x32xf32>
    %337 = arith.negf %336 : vector<2x32xf32>
    %338 = math.exp %337 : vector<2x32xf32>
    %cst_75 = arith.constant 1.000000e+00 : f32
    %339 = vector.broadcast %cst_75 : f32 to vector<2x32xf32>
    %340 = arith.addf %339, %338 : vector<2x32xf32>
    %341 = arith.divf %339, %340 : vector<2x32xf32>
    %342 = vector.extract_strided_slice %335 {offsets = [0, 32], sizes = [2, 32], strides = [1, 1]} : vector<2x128xf32> to vector<2x32xf32>
    %343 = arith.negf %342 : vector<2x32xf32>
    %344 = math.exp %343 : vector<2x32xf32>
    %cst_76 = arith.constant 1.000000e+00 : f32
    %345 = vector.broadcast %cst_76 : f32 to vector<2x32xf32>
    %346 = arith.addf %345, %344 : vector<2x32xf32>
    %347 = arith.divf %345, %346 : vector<2x32xf32>
    %348 = vector.extract_strided_slice %335 {offsets = [0, 64], sizes = [2, 32], strides = [1, 1]} : vector<2x128xf32> to vector<2x32xf32>
    %349 = math.tanh %348 : vector<2x32xf32>
    %350 = vector.extract_strided_slice %335 {offsets = [0, 96], sizes = [2, 32], strides = [1, 1]} : vector<2x128xf32> to vector<2x32xf32>
    %351 = arith.negf %350 : vector<2x32xf32>
    %352 = math.exp %351 : vector<2x32xf32>
    %cst_77 = arith.constant 1.000000e+00 : f32
    %353 = vector.broadcast %cst_77 : f32 to vector<2x32xf32>
    %354 = arith.addf %353, %352 : vector<2x32xf32>
    %355 = arith.divf %353, %354 : vector<2x32xf32>
    %356 = arith.mulf %347, %329 : vector<2x32xf32>
    %357 = arith.mulf %341, %349 : vector<2x32xf32>
    %358 = arith.addf %356, %357 : vector<2x32xf32>
    %359 = math.tanh %358 : vector<2x32xf32>
    %360 = arith.mulf %355, %359 : vector<2x32xf32>
    %c8_78 = arith.constant 8 : index
    %c0_79 = arith.constant 0 : index
    %361 = vector.load %arg16[%c8_78, %c0_79] : memref<16x32xf32, #tpu.memory_space<vmem>>, vector<2x32xf32>
    tpu.vector_store %arg16[%c8_78, %c0_79], %360 {strides = array<i32>} : memref<16x32xf32, #tpu.memory_space<vmem>>, vector<2x32xf32>,
    %362 = vector.extract_strided_slice %10 {offsets = [6, 0], sizes = [2, 128], strides = [1, 1]} : vector<16x128xf32> to vector<2x128xf32>
    %cst_80 = arith.constant dense<0.000000e+00> : vector<2x128xf32>
    %363 = tpu.matmul %360, %245, %cst_80 {dimension_numbers = #tpu.dot_dimension_numbers<[1], [0], [0], [1], [0, 0, 1, 1], [], []>} : vector<2x32xf32>, vector<32x128xf32>, vector<2x128xf32> -> vector<2x128xf32>
    %364 = arith.addf %362, %363 : vector<2x128xf32>
    %365 = vector.extract_strided_slice %364 {offsets = [0, 0], sizes = [2, 32], strides = [1, 1]} : vector<2x128xf32> to vector<2x32xf32>
    %366 = arith.negf %365 : vector<2x32xf32>
    %367 = math.exp %366 : vector<2x32xf32>
    %cst_81 = arith.constant 1.000000e+00 : f32
    %368 = vector.broadcast %cst_81 : f32 to vector<2x32xf32>
    %369 = arith.addf %368, %367 : vector<2x32xf32>
    %370 = arith.divf %368, %369 : vector<2x32xf32>
    %371 = vector.extract_strided_slice %364 {offsets = [0, 32], sizes = [2, 32], strides = [1, 1]} : vector<2x128xf32> to vector<2x32xf32>
    %372 = arith.negf %371 : vector<2x32xf32>
    %373 = math.exp %372 : vector<2x32xf32>
    %cst_82 = arith.constant 1.000000e+00 : f32
    %374 = vector.broadcast %cst_82 : f32 to vector<2x32xf32>
    %375 = arith.addf %374, %373 : vector<2x32xf32>
    %376 = arith.divf %374, %375 : vector<2x32xf32>
    %377 = vector.extract_strided_slice %364 {offsets = [0, 64], sizes = [2, 32], strides = [1, 1]} : vector<2x128xf32> to vector<2x32xf32>
    %378 = math.tanh %377 : vector<2x32xf32>
    %379 = vector.extract_strided_slice %364 {offsets = [0, 96], sizes = [2, 32], strides = [1, 1]} : vector<2x128xf32> to vector<2x32xf32>
    %380 = arith.negf %379 : vector<2x32xf32>
    %381 = math.exp %380 : vector<2x32xf32>
    %cst_83 = arith.constant 1.000000e+00 : f32
    %382 = vector.broadcast %cst_83 : f32 to vector<2x32xf32>
    %383 = arith.addf %382, %381 : vector<2x32xf32>
    %384 = arith.divf %382, %383 : vector<2x32xf32>
    %385 = arith.mulf %376, %358 : vector<2x32xf32>
    %386 = arith.mulf %370, %378 : vector<2x32xf32>
    %387 = arith.addf %385, %386 : vector<2x32xf32>
    %388 = math.tanh %387 : vector<2x32xf32>
    %389 = arith.mulf %384, %388 : vector<2x32xf32>
    %c6_84 = arith.constant 6 : index
    %c0_85 = arith.constant 0 : index
    %390 = vector.load %arg16[%c6_84, %c0_85] : memref<16x32xf32, #tpu.memory_space<vmem>>, vector<2x32xf32>
    tpu.vector_store %arg16[%c6_84, %c0_85], %389 {strides = array<i32>} : memref<16x32xf32, #tpu.memory_space<vmem>>, vector<2x32xf32>,
    %391 = vector.extract_strided_slice %10 {offsets = [4, 0], sizes = [2, 128], strides = [1, 1]} : vector<16x128xf32> to vector<2x128xf32>
    %cst_86 = arith.constant dense<0.000000e+00> : vector<2x128xf32>
    %392 = tpu.matmul %389, %245, %cst_86 {dimension_numbers = #tpu.dot_dimension_numbers<[1], [0], [0], [1], [0, 0, 1, 1], [], []>} : vector<2x32xf32>, vector<32x128xf32>, vector<2x128xf32> -> vector<2x128xf32>
    %393 = arith.addf %391, %392 : vector<2x128xf32>
    %394 = vector.extract_strided_slice %393 {offsets = [0, 0], sizes = [2, 32], strides = [1, 1]} : vector<2x128xf32> to vector<2x32xf32>
    %395 = arith.negf %394 : vector<2x32xf32>
    %396 = math.exp %395 : vector<2x32xf32>
    %cst_87 = arith.constant 1.000000e+00 : f32
    %397 = vector.broadcast %cst_87 : f32 to vector<2x32xf32>
    %398 = arith.addf %397, %396 : vector<2x32xf32>
    %399 = arith.divf %397, %398 : vector<2x32xf32>
    %400 = vector.extract_strided_slice %393 {offsets = [0, 32], sizes = [2, 32], strides = [1, 1]} : vector<2x128xf32> to vector<2x32xf32>
    %401 = arith.negf %400 : vector<2x32xf32>
    %402 = math.exp %401 : vector<2x32xf32>
    %cst_88 = arith.constant 1.000000e+00 : f32
    %403 = vector.broadcast %cst_88 : f32 to vector<2x32xf32>
    %404 = arith.addf %403, %402 : vector<2x32xf32>
    %405 = arith.divf %403, %404 : vector<2x32xf32>
    %406 = vector.extract_strided_slice %393 {offsets = [0, 64], sizes = [2, 32], strides = [1, 1]} : vector<2x128xf32> to vector<2x32xf32>
    %407 = math.tanh %406 : vector<2x32xf32>
    %408 = vector.extract_strided_slice %393 {offsets = [0, 96], sizes = [2, 32], strides = [1, 1]} : vector<2x128xf32> to vector<2x32xf32>
    %409 = arith.negf %408 : vector<2x32xf32>
    %410 = math.exp %409 : vector<2x32xf32>
    %cst_89 = arith.constant 1.000000e+00 : f32
    %411 = vector.broadcast %cst_89 : f32 to vector<2x32xf32>
    %412 = arith.addf %411, %410 : vector<2x32xf32>
    %413 = arith.divf %411, %412 : vector<2x32xf32>
    %414 = arith.mulf %405, %387 : vector<2x32xf32>
    %415 = arith.mulf %399, %407 : vector<2x32xf32>
    %416 = arith.addf %414, %415 : vector<2x32xf32>
    %417 = math.tanh %416 : vector<2x32xf32>
    %418 = arith.mulf %413, %417 : vector<2x32xf32>
    %c4_90 = arith.constant 4 : index
    %c0_91 = arith.constant 0 : index
    %419 = vector.load %arg16[%c4_90, %c0_91] : memref<16x32xf32, #tpu.memory_space<vmem>>, vector<2x32xf32>
    tpu.vector_store %arg16[%c4_90, %c0_91], %418 {strides = array<i32>} : memref<16x32xf32, #tpu.memory_space<vmem>>, vector<2x32xf32>,
    %420 = vector.extract_strided_slice %10 {offsets = [2, 0], sizes = [2, 128], strides = [1, 1]} : vector<16x128xf32> to vector<2x128xf32>
    %cst_92 = arith.constant dense<0.000000e+00> : vector<2x128xf32>
    %421 = tpu.matmul %418, %245, %cst_92 {dimension_numbers = #tpu.dot_dimension_numbers<[1], [0], [0], [1], [0, 0, 1, 1], [], []>} : vector<2x32xf32>, vector<32x128xf32>, vector<2x128xf32> -> vector<2x128xf32>
    %422 = arith.addf %420, %421 : vector<2x128xf32>
    %423 = vector.extract_strided_slice %422 {offsets = [0, 0], sizes = [2, 32], strides = [1, 1]} : vector<2x128xf32> to vector<2x32xf32>
    %424 = arith.negf %423 : vector<2x32xf32>
    %425 = math.exp %424 : vector<2x32xf32>
    %cst_93 = arith.constant 1.000000e+00 : f32
    %426 = vector.broadcast %cst_93 : f32 to vector<2x32xf32>
    %427 = arith.addf %426, %425 : vector<2x32xf32>
    %428 = arith.divf %426, %427 : vector<2x32xf32>
    %429 = vector.extract_strided_slice %422 {offsets = [0, 32], sizes = [2, 32], strides = [1, 1]} : vector<2x128xf32> to vector<2x32xf32>
    %430 = arith.negf %429 : vector<2x32xf32>
    %431 = math.exp %430 : vector<2x32xf32>
    %cst_94 = arith.constant 1.000000e+00 : f32
    %432 = vector.broadcast %cst_94 : f32 to vector<2x32xf32>
    %433 = arith.addf %432, %431 : vector<2x32xf32>
    %434 = arith.divf %432, %433 : vector<2x32xf32>
    %435 = vector.extract_strided_slice %422 {offsets = [0, 64], sizes = [2, 32], strides = [1, 1]} : vector<2x128xf32> to vector<2x32xf32>
    %436 = math.tanh %435 : vector<2x32xf32>
    %437 = vector.extract_strided_slice %422 {offsets = [0, 96], sizes = [2, 32], strides = [1, 1]} : vector<2x128xf32> to vector<2x32xf32>
    %438 = arith.negf %437 : vector<2x32xf32>
    %439 = math.exp %438 : vector<2x32xf32>
    %cst_95 = arith.constant 1.000000e+00 : f32
    %440 = vector.broadcast %cst_95 : f32 to vector<2x32xf32>
    %441 = arith.addf %440, %439 : vector<2x32xf32>
    %442 = arith.divf %440, %441 : vector<2x32xf32>
    %443 = arith.mulf %434, %416 : vector<2x32xf32>
    %444 = arith.mulf %428, %436 : vector<2x32xf32>
    %445 = arith.addf %443, %444 : vector<2x32xf32>
    %446 = math.tanh %445 : vector<2x32xf32>
    %447 = arith.mulf %442, %446 : vector<2x32xf32>
    %c2_96 = arith.constant 2 : index
    %c0_97 = arith.constant 0 : index
    %448 = vector.load %arg16[%c2_96, %c0_97] : memref<16x32xf32, #tpu.memory_space<vmem>>, vector<2x32xf32>
    tpu.vector_store %arg16[%c2_96, %c0_97], %447 {strides = array<i32>} : memref<16x32xf32, #tpu.memory_space<vmem>>, vector<2x32xf32>,
    %449 = vector.extract_strided_slice %10 {offsets = [0, 0], sizes = [2, 128], strides = [1, 1]} : vector<16x128xf32> to vector<2x128xf32>
    %cst_98 = arith.constant dense<0.000000e+00> : vector<2x128xf32>
    %450 = tpu.matmul %447, %245, %cst_98 {dimension_numbers = #tpu.dot_dimension_numbers<[1], [0], [0], [1], [0, 0, 1, 1], [], []>} : vector<2x32xf32>, vector<32x128xf32>, vector<2x128xf32> -> vector<2x128xf32>
    %451 = arith.addf %449, %450 : vector<2x128xf32>
    %452 = vector.extract_strided_slice %451 {offsets = [0, 0], sizes = [2, 32], strides = [1, 1]} : vector<2x128xf32> to vector<2x32xf32>
    %453 = arith.negf %452 : vector<2x32xf32>
    %454 = math.exp %453 : vector<2x32xf32>
    %cst_99 = arith.constant 1.000000e+00 : f32
    %455 = vector.broadcast %cst_99 : f32 to vector<2x32xf32>
    %456 = arith.addf %455, %454 : vector<2x32xf32>
    %457 = arith.divf %455, %456 : vector<2x32xf32>
    %458 = vector.extract_strided_slice %451 {offsets = [0, 32], sizes = [2, 32], strides = [1, 1]} : vector<2x128xf32> to vector<2x32xf32>
    %459 = arith.negf %458 : vector<2x32xf32>
    %460 = math.exp %459 : vector<2x32xf32>
    %cst_100 = arith.constant 1.000000e+00 : f32
    %461 = vector.broadcast %cst_100 : f32 to vector<2x32xf32>
    %462 = arith.addf %461, %460 : vector<2x32xf32>
    %463 = arith.divf %461, %462 : vector<2x32xf32>
    %464 = vector.extract_strided_slice %451 {offsets = [0, 64], sizes = [2, 32], strides = [1, 1]} : vector<2x128xf32> to vector<2x32xf32>
    %465 = math.tanh %464 : vector<2x32xf32>
    %466 = vector.extract_strided_slice %451 {offsets = [0, 96], sizes = [2, 32], strides = [1, 1]} : vector<2x128xf32> to vector<2x32xf32>
    %467 = arith.negf %466 : vector<2x32xf32>
    %468 = math.exp %467 : vector<2x32xf32>
    %cst_101 = arith.constant 1.000000e+00 : f32
    %469 = vector.broadcast %cst_101 : f32 to vector<2x32xf32>
    %470 = arith.addf %469, %468 : vector<2x32xf32>
    %471 = arith.divf %469, %470 : vector<2x32xf32>
    %472 = arith.mulf %463, %445 : vector<2x32xf32>
    %473 = arith.mulf %457, %465 : vector<2x32xf32>
    %474 = arith.addf %472, %473 : vector<2x32xf32>
    %475 = math.tanh %474 : vector<2x32xf32>
    %476 = arith.mulf %471, %475 : vector<2x32xf32>
    %c0_102 = arith.constant 0 : index
    %c0_103 = arith.constant 0 : index
    %477 = vector.load %arg16[%c0_102, %c0_103] : memref<16x32xf32, #tpu.memory_space<vmem>>, vector<2x32xf32>
    tpu.vector_store %arg16[%c0_102, %c0_103], %476 {strides = array<i32>} : memref<16x32xf32, #tpu.memory_space<vmem>>, vector<2x32xf32>,
    %c0_104 = arith.constant 0 : index
    %c0_105 = arith.constant 0 : index
    %478 = vector.load %arg15[%c0_104, %c0_105] : memref<16x32xf32, #tpu.memory_space<vmem>>, vector<16x32xf32>
    %c0_106 = arith.constant 0 : index
    %c0_107 = arith.constant 0 : index
    %479 = vector.load %arg7[%c0_106, %c0_107] : memref<32x64xf32, #tpu.memory_space<vmem>>, vector<32x64xf32>
    %cst_108 = arith.constant dense<0.000000e+00> : vector<16x64xf32>
    %480 = tpu.matmul %478, %479, %cst_108 {dimension_numbers = #tpu.dot_dimension_numbers<[1], [0], [0], [1], [0, 0, 1, 1], [], []>} : vector<16x32xf32>, vector<32x64xf32>, vector<16x64xf32> -> vector<16x64xf32>
    %c0_109 = arith.constant 0 : index
    %c0_110 = arith.constant 0 : index
    %481 = vector.load %arg16[%c0_109, %c0_110] : memref<16x32xf32, #tpu.memory_space<vmem>>, vector<16x32xf32>
    %c0_111 = arith.constant 0 : index
    %c0_112 = arith.constant 0 : index
    %482 = vector.load %arg8[%c0_111, %c0_112] : memref<32x64xf32, #tpu.memory_space<vmem>>, vector<32x64xf32>
    %cst_113 = arith.constant dense<0.000000e+00> : vector<16x64xf32>
    %483 = tpu.matmul %481, %482, %cst_113 {dimension_numbers = #tpu.dot_dimension_numbers<[1], [0], [0], [1], [0, 0, 1, 1], [], []>} : vector<16x32xf32>, vector<32x64xf32>, vector<16x64xf32> -> vector<16x64xf32>
    %484 = arith.addf %480, %483 : vector<16x64xf32>
    %c0_114 = arith.constant 0 : index
    %c0_115 = arith.constant 0 : index
    %485 = vector.load %arg9[%c0_114, %c0_115] : memref<1x64xf32, #tpu.memory_space<vmem>>, vector<1x64xf32>
    %486 = vector.broadcast %485 : vector<1x64xf32> to vector<16x64xf32>
    %487 = arith.addf %484, %486 : vector<16x64xf32>
    %cst_116 = arith.constant 0.000000e+00 : f32
    %488 = vector.broadcast %cst_116 : f32 to vector<16x64xf32>
    %489 = arith.maximumf %487, %488 : vector<16x64xf32>
    %c0_117 = arith.constant 0 : index
    %c0_118 = arith.constant 0 : index
    %490 = vector.load %arg10[%c0_117, %c0_118] : memref<64x48xf32, #tpu.memory_space<vmem>>, vector<64x48xf32>
    %cst_119 = arith.constant dense<0.000000e+00> : vector<16x48xf32>
    %491 = tpu.matmul %489, %490, %cst_119 {dimension_numbers = #tpu.dot_dimension_numbers<[1], [0], [0], [1], [0, 0, 1, 1], [], []>} : vector<16x64xf32>, vector<64x48xf32>, vector<16x48xf32> -> vector<16x48xf32>
    %c0_120 = arith.constant 0 : index
    %c0_121 = arith.constant 0 : index
    %492 = vector.load %arg11[%c0_120, %c0_121] : memref<1x48xf32, #tpu.memory_space<vmem>>, vector<1x48xf32>
    %493 = vector.broadcast %492 : vector<1x48xf32> to vector<16x48xf32>
    %494 = arith.addf %491, %493 : vector<16x48xf32>
    %cst_122 = arith.constant 0.000000e+00 : f32
    %495 = vector.broadcast %cst_122 : f32 to vector<16x48xf32>
    %496 = arith.maximumf %494, %495 : vector<16x48xf32>
    %c0_123 = arith.constant 0 : index
    %c0_124 = arith.constant 0 : index
    %497 = vector.load %arg12[%c0_123, %c0_124] : memref<48x16xf32, #tpu.memory_space<vmem>>, vector<48x16xf32>
    %cst_125 = arith.constant dense<0.000000e+00> : vector<16x16xf32>
    %498 = tpu.matmul %496, %497, %cst_125 {dimension_numbers = #tpu.dot_dimension_numbers<[1], [0], [0], [1], [0, 0, 1, 1], [], []>} : vector<16x48xf32>, vector<48x16xf32>, vector<16x16xf32> -> vector<16x16xf32>
    %c0_126 = arith.constant 0 : index
    %c0_127 = arith.constant 0 : index
    %499 = vector.load %arg13[%c0_126, %c0_127] : memref<1x16xf32, #tpu.memory_space<vmem>>, vector<1x16xf32>
    %500 = vector.broadcast %499 : vector<1x16xf32> to vector<16x16xf32>
    %501 = arith.addf %498, %500 : vector<16x16xf32>
    %c0_128 = arith.constant 0 : index
    %c0_129 = arith.constant 0 : index
    %502 = vector.load %arg14[%c0_128, %c0_129] : memref<16x16xf32, #tpu.memory_space<vmem>>, vector<16x16xf32>
    tpu.vector_store %arg14[%c0_128, %c0_129], %501 {strides = array<i32>} : memref<16x16xf32, #tpu.memory_space<vmem>>, vector<16x16xf32>,
    return
  }
}

</mosaic_0001>

<bundles_post_ra>
// kernel: videoregnet_forward.1
= control target key start
LH: loop header
LB: loop body
LE: loop exit
PB: predicated region body
PF: predicated region fallthrough
CT: control target
= control target key end

     0   :  { %vm61_vm0 = vcmask 261120   ;;  %v3122_v4 = vmov 0.0|0.0   ;;  %vm3123_vm1 = vmmov 0   ;;  %v3124_v13 = vmov 0.0   ;;  %s3645_s0 = inlined_call_operand.vmem [shape: f32[16,32], index: 0, kind: input, shape index: {}]   ;;  %s3646_s1 = inlined_call_operand.vmem [shape: f32[32,128], index: 1, kind: input, shape index: {}]   ;;  %s3647_s2 = inlined_call_operand.vmem [shape: f32[32,128], index: 2, kind: input, shape index: {}]   ;;  %s3648_s3 = inlined_call_operand.vmem [shape: f32[1,128], index: 3, kind: input, shape index: {}]   ;;  %s3649_s4 = inlined_call_operand.vmem [shape: f32[32,128], index: 4, kind: input, shape index: {}]   ;;  %s3650_s5 = inlined_call_operand.vmem [shape: f32[32,128], index: 5, kind: input, shape index: {}]   ;;  %s3651_s6 = inlined_call_operand.vmem [shape: f32[1,128], index: 6, kind: input, shape index: {}]   ;;  %s3652_s7 = inlined_call_operand.vmem [shape: f32[32,64], index: 7, kind: input, shape index: {}]   ;;  %s3653_s8 = inlined_call_operand.vmem [shape: f32[32,64], index: 8, kind: input, shape index: {}]   ;;  %s3654_s9 = inlined_call_operand.vmem [shape: f32[1,64], index: 9, kind: input, shape index: {}]   ;;  %s3655_s10 = inlined_call_operand.vmem [shape: f32[64,48], index: 10, kind: input, shape index: {}]   ;;  %s3656_s11 = inlined_call_operand.vmem [shape: f32[1,48], index: 11, kind: input, shape index: {}]   ;;  %s3657_s12 = inlined_call_operand.vmem [shape: f32[48,16], index: 12, kind: input, shape index: {}]   ;;  %s3658_s13 = inlined_call_operand.vmem [shape: f32[1,16], index: 13, kind: input, shape index: {}]   ;;  %s3659_s14 = inlined_call_operand.hbm [shape: f32[16,16], index: 14, kind: output, shape index: {}]  }
   0x1   :  { %v50_v0 = vld [vmem:[%s3646_s1] sm:$0xff]  ;;  %v51_v1 = vld [vmem:[%s3646_s1 + $0x8] sm:$0xff]  ;;  %2820 = vmatprep.subr.bf16.mxu0 %v3122_v4  ;;  %v52_v6 = vld [vmem:[%s3646_s1 + $0x10] sm:$0xff]  ;;  %2580 = vmatprep.mubr.msk.f32.mxu0 %vm3123_vm1, %v3124_v13 }
   0x2   :  { %v229_v2 = vld [vmem:[%s3647_s2] sm:$0xff]  ;;  %v2804_v3 = vpack.c.bf16 %v51_v1, %v50_v0  ;;  %v230_v5 = vld [vmem:[%s3647_s2 + $0x8] sm:$0xff]  ;;  %v53_v7 = vld [vmem:[%s3646_s1 + $0x18] sm:$0xff] }
   0x3   :  { %v3224_v8 = vpack.c.bf16 %v230_v5, %v229_v2  ;;  %v2808_v9 = vpack.c.bf16 %v53_v7, %v52_v6  ;;  %v48_v10 = vld [vmem:[%s3645_s0] sm:$0xff]  ;;  %v231_v11 = vld [vmem:[%s3647_s2 + $0x10] sm:$0xff]  ;;  %v232_v12 = vld [vmem:[%s3647_s2 + $0x18] sm:$0xff] }
   0x4   :  { %2805 = vmatprep.subr.bf16.mxu1 %v2804_v3  ;;  %2558 = vmatprep.mubr.msk.f32.mxu1 %vm61_vm0, %v48_v10 }
   0x5   :  { %19 = vsyncpa [#allocation5], 0  ;;  %2807 = vmatpush3.bf16.msra.mxu1 %v2804_v3  ;;  %2822 = vmatpush3.bf16.msra.mxu0 %v3224_v8  ;;  %v3239_v14 = vpack.c.bf16 %v232_v12, %v231_v11  ;;  %v49_v15 = vld [vmem:[%s3645_s0 + $0x8] sm:$0xff]  ;;  %v2381_v16 = vld [vmem:[%s3648_s3] ss:$0 sm:$0xff]  ;;  %s3125_s16 = smov 64  }
   0x6   :  { %2809 = vmatprep.subr.bf16.mxu1 %v2808_v9  ;;  %2823 = vmatprep.subr.bf16.mxu0 %v3122_v4  ;;  %s3126_s3 = smov 32   ;;  %v143_v34 = vld [vmem:[%s3649_s4] sm:$0xff]  ;;  %v144_v35 = vld [vmem:[%s3649_s4 + $0x8] sm:$0xff]  ;;  %v145_v36 = vld [vmem:[%s3649_s4 + $0x10] sm:$0xff]  ;;  %vm335_vm2 = vcmask 254976   ;;  %vm556_vm3 = vcmask 259076  }
   0x7   :  { %v2812_v37 = vpack.c.bf16 %v144_v35, %v143_v34  ;;  %v146_v38 = vld [vmem:[%s3649_s4 + $0x18] sm:$0xff]  ;;  %v3291_v43 = vld [vmem:[%s3651_s6] ss:$0 sm:$0xff]  ;;  %vm668_vm4 = vcmask 261126   ;;  %vm444_vm5 = vcmask 257026   ;;  %vm2183_vm6 = vcmask 523264  }
   0x8   :  { %v2816_v39 = vpack.c.bf16 %v146_v38, %v145_v36  ;;  %vm2280_vm7 = vcmask 392192   ;;  %vm2362_vm8 = vcmask 130048  }
   0x9   :  { %2811 = vmatpush3.bf16.msra.mxu1 %v2808_v9  ;;  %2825 = vmatpush3.bf16.msra.mxu0 %v3239_v14 }
   0xa   :  { %2832 = vmatprep.subr.bf16.mxu0 %v3122_v4  ;;  %2813 = vmatprep.subr.bf16.mxu1 %v2812_v37 }
   0xc   :  { %2559 = vmatmul.mubr.msk.f32.vlgmr.msra.gmra.mrb[0].mxu1 %vm61_vm0, %v49_v15  ;;  %2581 = vmatmul.mubr.f32.vlgmr.msra.gmra.mrb[0].mxu0 %v3124_v13 }
   0xd   :  { %2569 = vmatprep.mubr.msk.f32.mxu1 %vm61_vm0, %v48_v10  ;;  %2834 = vmatpush3.bf16.msra.mxu0 %v3224_v8 }
   0xe   :  { %2835 = vmatprep.subr.bf16.mxu0 %v3122_v4  ;;  %2602 = vmatprep.mubr.msk.f32.mxu0 %vm3123_vm1, %v3124_v13 }
   0xf   :  { %2815 = vmatpush3.bf16.msra.mxu1 %v2812_v37 }
  0x10   :  { %2817 = vmatprep.subr.bf16.mxu1 %v2816_v39 }
  0x11   :  { %2837 = vmatpush3.bf16.msra.mxu0 %v3239_v14 }
  0x12   :  { %2844 = vmatprep.subr.bf16.mxu0 %v3122_v4 }
  0x13   :  { %2819 = vmatpush3.bf16.msra.mxu1 %v2816_v39 }
  0x14   :  { %2826 = vmatprep.subr.bf16.mxu1 %v3122_v4 }
  0x16   :  { %2570 = vmatmul.mubr.msk.f32.vlgmr.msra.gmra.mrb[2].mxu1 %vm61_vm0, %v49_v15 }
  0x17   :  { %2828 = vmatpush3.bf16.msra.mxu1 %v3224_v8  ;;  %2591 = vmatprep.mubr.msk.f32.mxu1 %vm3123_vm1, %v3124_v13 }
  0x18   :  { %2829 = vmatprep.subr.bf16.mxu1 %v3122_v4 }
  0x1b   :  { %2831 = vmatpush3.bf16.msra.mxu1 %v3239_v14 }
  0x1c   :  { %2838 = vmatprep.subr.bf16.mxu1 %v3122_v4 }
  0xdf   :  { %v2560_v17 = vpop.f32.mrb[0].mxu1  ;;  %v302_v18 = vpop.f32.mrb[0].mxu0 }
  0xe0   :  { %v3259_v19 = vadd.f32 %v2560_v17, %v2381_v16  ;;  %v134_v20 = vpop.f32.mrb[1].mxu1  ;;  %v2582_v21 = vpop.f32.mrb[1].mxu0 }
  0xe1   :  { %v3261_v22 = vadd.f32 %v2381_v16, %v134_v20 }
  0xe3   :  { %v306_v23 = vadd.f32 %v302_v18, %v3261_v22 }
  0xe5   :  { %2970 = vtanh.f32 %v306_v23  ;;  %v2387_v25 = vmul.f32 -1.442695, %v306_v23 }
  0xe7   :  { %2972 = vpow2.f32 %v2387_v25 }
  0xe9   :  { %v3293_v44 = vpop.f32.mrb[2].mxu1 }
  0xea   :  { %v220_v45 = vpop.f32.mrb[3].mxu1 }
  0xeb   :  { %v3296_v46 = vadd.f32 %v3291_v43, %v220_v45 }
  0xef   :  { %v2971_v24 = vpop.eup %2970 }
  0xf0   :  { %316 = vrot.lane.b32.xlu0 %v2971_v24, %s3125_s16 }
  0xf1   :  { %v2973_v26 = vpop.eup %2972 }
  0xf2   :  { %v310_v27 = vadd.f32 1.0, %v2973_v26 }
  0xf4   :  { %2974 = vrcp.f32 %v310_v27 }
  0xfe   :  { %v2975_v28 = vpop.eup %2974 }
  0xff   :  { %v314_v31 = vmul.f32 0.0, %v2975_v28 }
 0x162   :  { %v317_v29 = vpop.permute.xlu0 %316 }
 0x163   :  { %v319_v30 = vmul.f32 %v2975_v28, %v317_v29 }
 0x165   :  { %321 = vrot.lane.b32.xlu0 %v319_v30, %s3126_s3 }
 0x1d7   :  { %v322_v32 = vpop.permute.xlu0 %321 }
 0x1d8   :  { %v324_v33 = vadd.f32 %v322_v32, %v314_v31 }
 0x1da   :  { %2976 = vtanh.f32 %v324_v33  ;;  %v421_v59 = vrot.slane %v324_v33, 6 }
 0x1e4   :  { %v2977_v40 = vpop.eup %2976 }
 0x1e5   :  { %327 = vrot.lane.b32.xlu1 %v2977_v40, %s3125_s16 }
 0x257   :  { %v328_v41 = vpop.permute.xlu1 %327 }
 0x258   :  { %v330_v42 = vmul.f32 %v2975_v28, %v328_v41 }
 0x25a   :  { %332 = vrot.lane.b32.xlu1 %v330_v42, %s3126_s3 }
 0x2cc   :  { %v333_v47 = vpop.permute.xlu1 %332 }
 0x2cd   :  { %336 = vst.msk [vmem:[#allocation2] sm:$0x3] %vm335_vm2, %v333_v47  ;;  %2592 = vmatmul.mubr.msk.f32.vlgmr.msra.gmra.mrb[4].mxu1 %vm61_vm0, %v333_v47 }
 0x2ce   :  { %2840 = vmatpush3.bf16.msra.mxu1 %v3224_v8  ;;  %2613 = vmatprep.mubr.msk.f32.mxu1 %vm3123_vm1, %v3124_v13 }
 0x2cf   :  { %2841 = vmatprep.subr.bf16.mxu1 %v3122_v4 }
 0x2d2   :  { %2843 = vmatpush3.bf16.msra.mxu1 %v3239_v14 }
 0x2d3   :  { %2850 = vmatprep.subr.bf16.mxu1 %v3122_v4 }
 0x3a0   :  { %v405_v48 = vpop.f32.mrb[4].mxu1 }
 0x3a1   :  { %v410_v49 = vrot.slane %v405_v48, 6  ;;  %v2593_v50 = vpop.f32.mrb[5].mxu1 }
 0x3a3   :  { %v412_v51 = vadd.f32 %v410_v49, %v3261_v22 }
 0x3a5   :  { %2978 = vtanh.f32 %v412_v51  ;;  %v2389_v53 = vmul.f32 -1.442695, %v412_v51 }
 0x3a7   :  { %2980 = vpow2.f32 %v2389_v53 }
 0x3af   :  { %v2979_v52 = vpop.eup %2978 }
 0x3b0   :  { %425 = vrot.lane.b32.xlu0 %v2979_v52, %s3125_s16 }
 0x3b1   :  { %v2981_v54 = vpop.eup %2980 }
 0x3b2   :  { %v416_v55 = vadd.f32 1.0, %v2981_v54 }
 0x3b4   :  { %2982 = vrcp.f32 %v416_v55 }
 0x3be   :  { %v2983_v56 = vpop.eup %2982 }
 0x3bf   :  { %v423_v60 = vmul.f32 %v2983_v56, %v421_v59 }
 0x422   :  { %v426_v57 = vpop.permute.xlu0 %425 }
 0x423   :  { %v428_v58 = vmul.f32 %v2983_v56, %v426_v57 }
 0x425   :  { %430 = vrot.lane.b32.xlu1 %v428_v58, %s3126_s3 }
 0x497   :  { %v431_v61 = vpop.permute.xlu1 %430 }
 0x498   :  { %v433_v62 = vadd.f32 %v431_v61, %v423_v60 }
 0x49a   :  { %2984 = vtanh.f32 %v433_v62  ;;  %v533_v20 = vrot.slane %v433_v62, 6 }
 0x4a4   :  { %v2985_v63 = vpop.eup %2984 }
 0x4a5   :  { %436 = vrot.lane.b32.xlu0 %v2985_v63, %s3125_s16 }
 0x517   :  { %v437_v0 = vpop.permute.xlu0 %436 }
 0x518   :  { %v3310_v1 = vmul.f32 %v2983_v56, %v437_v0 }
 0x51a   :  { %v446_v2 = vrot.slane %v3310_v1, 2 }
 0x51c   :  { %447 = vrot.lane.b32.xlu1 %v446_v2, %s3126_s3 }
 0x58e   :  { %v448_v3 = vpop.permute.xlu1 %447 }
 0x58f   :  { %2603 = vmatmul.mubr.msk.f32.vlgmr.msra.gmra.mrb[2].mxu0 %vm61_vm0, %v448_v3 }
 0x590   :  { %2846 = vmatpush3.bf16.msra.mxu0 %v3224_v8  ;;  %2624 = vmatprep.mubr.msk.f32.mxu0 %vm3123_vm1, %v3124_v13 }
 0x591   :  { %2847 = vmatprep.subr.bf16.mxu0 %v3122_v4 }
 0x594   :  { %2849 = vmatpush3.bf16.msra.mxu0 %v3239_v14 }
 0x595   :  { %2856 = vmatprep.subr.bf16.mxu0 %v3122_v4 }
 0x662   :  { %v517_v5 = vpop.f32.mrb[2].mxu0 }
 0x663   :  { %v522_v6 = vrot.slane %v517_v5, 4  ;;  %v2604_v7 = vpop.f32.mrb[3].mxu0 }
 0x665   :  { %v524_v9 = vadd.f32 %v522_v6, %v3261_v22 }
 0x667   :  { %2986 = vtanh.f32 %v524_v9  ;;  %v2391_v11 = vmul.f32 -1.442695, %v524_v9 }
 0x669   :  { %2988 = vpow2.f32 %v2391_v11 }
 0x671   :  { %v2987_v10 = vpop.eup %2986 }
 0x672   :  { %537 = vrot.lane.b32.xlu0 %v2987_v10, %s3125_s16 }
 0x673   :  { %v2989_v12 = vpop.eup %2988 }
 0x674   :  { %v528_v15 = vadd.f32 1.0, %v2989_v12 }
 0x676   :  { %2990 = vrcp.f32 %v528_v15 }
 0x680   :  { %v2991_v16 = vpop.eup %2990 }
 0x681   :  { %v535_v21 = vmul.f32 %v2991_v16, %v533_v20 }
 0x6e4   :  { %v538_v17 = vpop.permute.xlu0 %537 }
 0x6e5   :  { %v540_v18 = vmul.f32 %v2991_v16, %v538_v17 }
 0x6e7   :  { %542 = vrot.lane.b32.xlu1 %v540_v18, %s3126_s3 }
 0x759   :  { %v543_v23 = vpop.permute.xlu1 %542 }
 0x75a   :  { %v545_v24 = vadd.f32 %v543_v23, %v535_v21 }
 0x75c   :  { %2992 = vtanh.f32 %v545_v24  ;;  %v645_v41 = vrot.slane %v545_v24, 6 }
 0x766   :  { %v2993_v25 = vpop.eup %2992 }
 0x767   :  { %548 = vrot.lane.b32.xlu0 %v2993_v25, %s3125_s16 }
 0x7d9   :  { %v549_v26 = vpop.permute.xlu0 %548 }
 0x7da   :  { %v3325_v27 = vmul.f32 %v2991_v16, %v549_v26 }
 0x7dc   :  { %v558_v28 = vrot.slane %v3325_v27, 4 }
 0x7de   :  { %559 = vrot.lane.b32.xlu1 %v558_v28, %s3126_s3 }
 0x850   :  { %v560_v29 = vpop.permute.xlu1 %559 }
 0x851   :  { %2614 = vmatmul.mubr.msk.f32.vlgmr.msra.gmra.mrb[6].mxu1 %vm61_vm0, %v560_v29 }
 0x852   :  { %2852 = vmatpush3.bf16.msra.mxu1 %v3224_v8  ;;  %2635 = vmatprep.mubr.msk.f32.mxu1 %vm3123_vm1, %v3124_v13 }
 0x853   :  { %2853 = vmatprep.subr.bf16.mxu1 %v3122_v4 }
 0x856   :  { %2855 = vmatpush3.bf16.msra.mxu1 %v3239_v14 }
 0x857   :  { %2862 = vmatprep.subr.bf16.mxu1 %v3122_v4 }
 0x924   :  { %v629_v30 = vpop.f32.mrb[6].mxu1 }
 0x925   :  { %v634_v31 = vrot.slane %v629_v30, 2  ;;  %v2615_v32 = vpop.f32.mrb[7].mxu1 }
 0x926   :  { %v1109_v32 = vld [vmem:[%s3650_s5 + $0x8] sm:$0xff] }
 0x927   :  { %v636_v33 = vadd.f32 %v634_v31, %v3261_v22  ;;  %v1108_v31 = vld [vmem:[%s3650_s5] sm:$0xff] }
 0x929   :  { %2994 = vtanh.f32 %v636_v33  ;;  %v2393_v35 = vmul.f32 -1.442695, %v636_v33  ;;  %v3378_v33 = vpack.c.bf16 %v1109_v32, %v1108_v31 }
 0x92b   :  { %2996 = vpow2.f32 %v2393_v35  ;;  %v1111_v35 = vld [vmem:[%s3650_s5 + $0x18] sm:$0xff] }
 0x933   :  { %v2995_v34 = vpop.eup %2994 }
 0x934   :  { %649 = vrot.lane.b32.xlu0 %v2995_v34, %s3125_s16  ;;  %v1110_v34 = vld [vmem:[%s3650_s5 + $0x10] sm:$0xff] }
 0x935   :  { %v2997_v36 = vpop.eup %2996 }
 0x936   :  { %v640_v37 = vadd.f32 1.0, %v2997_v36 }
 0x938   :  { %2998 = vrcp.f32 %v640_v37  ;;  %v3388_v37 = vpack.c.bf16 %v1111_v35, %v1110_v34 }
 0x942   :  { %v2999_v38 = vpop.eup %2998 }
 0x943   :  { %v647_v42 = vmul.f32 %v2999_v38, %v645_v41 }
 0x9a6   :  { %v650_v39 = vpop.permute.xlu0 %649 }
 0x9a7   :  { %v652_v40 = vmul.f32 %v2999_v38, %v650_v39 }
 0x9a9   :  { %654 = vrot.lane.b32.xlu1 %v652_v40, %s3126_s3 }
 0xa1b   :  { %v655_v45 = vpop.permute.xlu1 %654 }
 0xa1c   :  { %v657_v47 = vadd.f32 %v655_v45, %v647_v42  ;;  %v3405_v45 = vadd.f32 %v3293_v44, %v3291_v43 }
 0xa1e   :  { %3000 = vtanh.f32 %v657_v47  ;;  %v754_v62 = vrot.slane %v657_v47, 6 }
 0xa28   :  { %v3001_v22 = vpop.eup %3000 }
 0xa29   :  { %660 = vrot.lane.b32.xlu0 %v3001_v22, %s3125_s16 }
 0xa9b   :  { %v661_v48 = vpop.permute.xlu0 %660 }
 0xa9c   :  { %v3340_v49 = vmul.f32 %v2999_v38, %v661_v48 }
 0xa9e   :  { %v670_v50 = vrot.slane %v3340_v49, 6 }
 0xaa0   :  { %671 = vrot.lane.b32.xlu1 %v670_v50, %s3126_s3 }
 0xb12   :  { %v672_v51 = vpop.permute.xlu1 %671 }
 0xb13   :  { %2625 = vmatmul.mubr.msk.f32.vlgmr.msra.gmra.mrb[4].mxu0 %vm61_vm0, %v672_v51 }
 0xb14   :  { %2858 = vmatpush3.bf16.msra.mxu0 %v3224_v8  ;;  %2646 = vmatprep.mubr.msk.f32.mxu0 %vm3123_vm1, %v3124_v13 }
 0xb15   :  { %2859 = vmatprep.subr.bf16.mxu0 %v3122_v4 }
 0xb18   :  { %2861 = vmatpush3.bf16.msra.mxu0 %v3239_v14 }
 0xb19   :  { %2868 = vmatprep.subr.bf16.mxu0 %v3122_v4 }
 0xbe6   :  { %v741_v52 = vpop.f32.mrb[4].mxu0 }
 0xbe7   :  { %v745_v53 = vadd.f32 %v741_v52, %v3259_v19  ;;  %v2626_v54 = vpop.f32.mrb[5].mxu0 }
 0xbe9   :  { %3002 = vtanh.f32 %v745_v53  ;;  %v2395_v56 = vmul.f32 -1.442695, %v745_v53 }
 0xbeb   :  { %3004 = vpow2.f32 %v2395_v56 }
 0xbf3   :  { %v3003_v55 = vpop.eup %3002 }
 0xbf4   :  { %758 = vrot.lane.b32.xlu0 %v3003_v55, %s3125_s16 }
 0xbf5   :  { %v3005_v57 = vpop.eup %3004 }
 0xbf6   :  { %v749_v58 = vadd.f32 1.0, %v3005_v57 }
 0xbf8   :  { %3006 = vrcp.f32 %v749_v58 }
 0xc02   :  { %v3007_v59 = vpop.eup %3006 }
 0xc03   :  { %v756_v63 = vmul.f32 %v3007_v59, %v754_v62 }
 0xc66   :  { %v759_v60 = vpop.permute.xlu0 %758 }
 0xc67   :  { %v761_v61 = vmul.f32 %v3007_v59, %v759_v60 }
 0xc69   :  { %763 = vrot.lane.b32.xlu1 %v761_v61, %s3126_s3 }
 0xcdb   :  { %v764_v0 = vpop.permute.xlu1 %763 }
 0xcdc   :  { %v766_v2 = vadd.f32 %v764_v0, %v756_v63 }
 0xcde   :  { %3008 = vtanh.f32 %v766_v2 }
 0xce8   :  { %v3009_v3 = vpop.eup %3008 }
 0xce9   :  { %769 = vrot.lane.b32.xlu0 %v3009_v3, %s3125_s16 }
 0xd5b   :  { %v770_v5 = vpop.permute.xlu0 %769 }
 0xd5c   :  { %v772_v6 = vmul.f32 %v3007_v59, %v770_v5 }
 0xd5e   :  { %774 = vrot.lane.b32.xlu1 %v772_v6, %s3126_s3 }
 0xdd0   :  { %v775_v7 = vpop.permute.xlu1 %774 }
 0xdd1   :  { %777 = vst.msk [vmem:[#allocation2 + $0x8] sm:$0x3] %vm335_vm2, %v775_v7  ;;  %2636 = vmatmul.mubr.msk.f32.vlgmr.msra.gmra.mrb[8].mxu1 %vm61_vm0, %v775_v7 }
 0xdd2   :  { %2864 = vmatpush3.bf16.msra.mxu1 %v3224_v8  ;;  %2657 = vmatprep.mubr.msk.f32.mxu1 %vm3123_vm1, %v3124_v13 }
 0xdd3   :  { %2865 = vmatprep.subr.bf16.mxu1 %v3122_v4 }
 0xdd6   :  { %2867 = vmatpush3.bf16.msra.mxu1 %v3239_v14  ;;  %v862_v14 = vrot.slane %v766_v2, 6 }
 0xdd7   :  { %2874 = vmatprep.subr.bf16.mxu1 %v3122_v4 }
 0xea4   :  { %v846_v9 = vpop.f32.mrb[8].mxu1 }
 0xea5   :  { %v851_v10 = vrot.slane %v846_v9, 6  ;;  %v2637_v11 = vpop.f32.mrb[9].mxu1 }
 0xea7   :  { %v853_v12 = vadd.f32 %v851_v10, %v3259_v19 }
 0xea9   :  { %3010 = vtanh.f32 %v853_v12  ;;  %v2397_v16 = vmul.f32 -1.442695, %v853_v12 }
 0xeab   :  { %3012 = vpow2.f32 %v2397_v16 }
 0xeb3   :  { %v3011_v15 = vpop.eup %3010 }
 0xeb4   :  { %866 = vrot.lane.b32.xlu0 %v3011_v15, %s3125_s16 }
 0xeb5   :  { %v3013_v8 = vpop.eup %3012 }
 0xeb6   :  { %v857_v17 = vadd.f32 1.0, %v3013_v8 }
 0xeb8   :  { %3014 = vrcp.f32 %v857_v17 }
 0xec2   :  { %v3015_v18 = vpop.eup %3014 }
 0xec3   :  { %v864_v23 = vmul.f32 %v3015_v18, %v862_v14 }
 0xf26   :  { %v867_v20 = vpop.permute.xlu0 %866 }
 0xf27   :  { %v869_v21 = vmul.f32 %v3015_v18, %v867_v20 }
 0xf29   :  { %871 = vrot.lane.b32.xlu1 %v869_v21, %s3126_s3 }
 0xf9b   :  { %v872_v24 = vpop.permute.xlu1 %871 }
 0xf9c   :  { %v874_v25 = vadd.f32 %v872_v24, %v864_v23 }
 0xf9e   :  { %3016 = vtanh.f32 %v874_v25  ;;  %v973_v62 = vrot.slane %v874_v25, 6 }
 0xfa8   :  { %v3017_v26 = vpop.eup %3016 }
 0xfa9   :  { %877 = vrot.lane.b32.xlu0 %v3017_v26, %s3125_s16 }
0x101b   :  { %v878_v28 = vpop.permute.xlu0 %877 }
0x101c   :  { %v3368_v29 = vmul.f32 %v3015_v18, %v878_v28 }
0x101e   :  { %v886_v30 = vrot.slane %v3368_v29, 2 }
0x1020   :  { %887 = vrot.lane.b32.xlu1 %v886_v30, %s3126_s3 }
0x1092   :  { %v888_v36 = vpop.permute.xlu1 %887 }
0x1093   :  { %2647 = vmatmul.mubr.msk.f32.vlgmr.msra.gmra.mrb[6].mxu0 %vm61_vm0, %v888_v36 }
0x1094   :  { %2870 = vmatpush3.bf16.msra.mxu0 %v3378_v33  ;;  %2668 = vmatprep.mubr.msk.f32.mxu0 %vm3123_vm1, %v3124_v13 }
0x1095   :  { %2871 = vmatprep.subr.bf16.mxu0 %v3122_v4 }
0x1098   :  { %2873 = vmatpush3.bf16.msra.mxu0 %v3388_v37 }
0x1099   :  { %2880 = vmatprep.subr.bf16.mxu0 %v3122_v4 }
0x109b   :  { %2669 = vmatmul.mubr.f32.vlgmr.msra.gmra.mrb[8].mxu0 %v3124_v13 }
0x109c   :  { %2882 = vmatpush3.bf16.msra.mxu0 %v3378_v33  ;;  %2690 = vmatprep.mubr.msk.f32.mxu0 %vm3123_vm1, %v3124_v13 }
0x109d   :  { %2883 = vmatprep.subr.bf16.mxu0 %v3122_v4 }
0x10a0   :  { %2885 = vmatpush3.bf16.msra.mxu0 %v3388_v37 }
0x10a1   :  { %2892 = vmatprep.subr.bf16.mxu0 %v3122_v4 }
0x1166   :  { %v957_v38 = vpop.f32.mrb[6].mxu0 }
0x1167   :  { %v962_v39 = vrot.slane %v957_v38, 4  ;;  %v2648_v40 = vpop.f32.mrb[7].mxu0 }
0x1169   :  { %v964_v41 = vadd.f32 %v962_v39, %v3259_v19 }
0x116b   :  { %3018 = vtanh.f32 %v964_v41  ;;  %v2399_v52 = vmul.f32 -1.442695, %v964_v41 }
0x116e   :  { %v1178_v42 = vpop.f32.mrb[8].mxu0 }
0x116f   :  { %v1183_v47 = vrot.slane %v1178_v42, 2  ;;  %v2670_v22 = vpop.f32.mrb[9].mxu0 }
0x1171   :  { %v1185_v48 = vadd.f32 %v1183_v47, %v3405_v45 }
0x1173   :  { %3020 = vtanh.f32 %v1185_v48  ;;  %v2402_v53 = vmul.f32 -1.442695, %v1185_v48 }
0x1174   :  { %3022 = vpow2.f32 %v2399_v52 }
0x1175   :  { %v3019_v50 = vpop.eup %3018  ;;  %3024 = vpow2.f32 %v2402_v53 }
0x1176   :  { %977 = vrot.lane.b32.xlu0 %v3019_v50, %s3125_s16 }
0x117d   :  { %v3021_v51 = vpop.eup %3020 }
0x117e   :  { %1195 = vrot.lane.b32.xlu1 %v3021_v51, %s3125_s16  ;;  %v3023_v54 = vpop.eup %3022 }
0x117f   :  { %v968_v55 = vadd.f32 1.0, %v3023_v54  ;;  %v3025_v43 = vpop.eup %3024 }
0x1180   :  { %v1189_v44 = vadd.f32 1.0, %v3025_v43 }
0x1181   :  { %3026 = vrcp.f32 %v968_v55 }
0x1182   :  { %3028 = vrcp.f32 %v1189_v44 }
0x118b   :  { %v3027_v56 = vpop.eup %3026 }
0x118c   :  { %v3029_v59 = vpop.eup %3028  ;;  %v975_v63 = vmul.f32 %v3027_v56, %v973_v62 }
0x118d   :  { %v1193_v3 = vmul.f32 0.0, %v3029_v59 }
0x11e8   :  { %v978_v57 = vpop.permute.xlu0 %977 }
0x11e9   :  { %v980_v58 = vmul.f32 %v3027_v56, %v978_v57 }
0x11eb   :  { %982 = vrot.lane.b32.xlu0 %v980_v58, %s3126_s3 }
0x11f0   :  { %v1196_v60 = vpop.permute.xlu1 %1195 }
0x11f1   :  { %v1198_v61 = vmul.f32 %v3029_v59, %v1196_v60 }
0x11f3   :  { %1200 = vrot.lane.b32.xlu1 %v1198_v61, %s3126_s3 }
0x125d   :  { %v983_v0 = vpop.permute.xlu0 %982 }
0x125e   :  { %v3412_v2 = vadd.f32 %v983_v0, %v975_v63 }
0x1260   :  { %3030 = vtanh.f32 %v3412_v2 }
0x1265   :  { %v1201_v5 = vpop.permute.xlu1 %1200 }
0x1266   :  { %v1203_v6 = vadd.f32 %v1201_v5, %v1193_v3 }
0x1268   :  { %3032 = vtanh.f32 %v1203_v6  ;;  %v1302_v36 = vrot.slane %v1203_v6, 2 }
0x126a   :  { %v3031_v7 = vpop.eup %3030 }
0x126b   :  { %988 = vrot.lane.b32.xlu0 %v3031_v7, %s3125_s16 }
0x1272   :  { %v3033_v9 = vpop.eup %3032 }
0x1273   :  { %1206 = vrot.lane.b32.xlu1 %v3033_v9, %s3125_s16 }
0x12dd   :  { %v989_v10 = vpop.permute.xlu0 %988 }
0x12de   :  { %v3417_v11 = vmul.f32 %v3027_v56, %v989_v10 }
0x12e0   :  { %v997_v12 = vrot.slane %v3417_v11, 4 }
0x12e2   :  { %998 = vrot.lane.b32.xlu0 %v997_v12, %s3126_s3 }
0x12e5   :  { %v1207_v15 = vpop.permute.xlu1 %1206 }
0x12e6   :  { %v3421_v16 = vmul.f32 %v3029_v59, %v1207_v15 }
0x12e8   :  { %v1215_v8 = vrot.slane %v3421_v16, 6 }
0x12ea   :  { %1216 = vrot.lane.b32.xlu1 %v1215_v8, %s3126_s3 }
0x1354   :  { %v999_v17 = vpop.permute.xlu0 %998 }
0x1355   :  { %2658 = vmatmul.mubr.msk.f32.vlgmr.msra.gmra.mrb[10].mxu1 %vm61_vm0, %v999_v17 }
0x1356   :  { %2876 = vmatpush3.bf16.msra.mxu1 %v3378_v33  ;;  %2679 = vmatprep.mubr.msk.f32.mxu1 %vm3123_vm1, %v3124_v13 }
0x1357   :  { %2877 = vmatprep.subr.bf16.mxu1 %v3122_v4 }
0x135a   :  { %2879 = vmatpush3.bf16.msra.mxu1 %v3388_v37 }
0x135b   :  { %2886 = vmatprep.subr.bf16.mxu1 %v3122_v4 }
0x135c   :  { %v1217_v18 = vpop.permute.xlu1 %1216 }
0x135d   :  { %2680 = vmatmul.mubr.msk.f32.vlgmr.msra.gmra.mrb[12].mxu1 %vm61_vm0, %v1217_v18 }
0x135e   :  { %2888 = vmatpush3.bf16.msra.mxu1 %v3378_v33  ;;  %2701 = vmatprep.mubr.msk.f32.mxu1 %vm3123_vm1, %v3124_v13 }
0x135f   :  { %2889 = vmatprep.subr.bf16.mxu1 %v3122_v4 }
0x1362   :  { %2891 = vmatpush3.bf16.msra.mxu1 %v3388_v37 }
0x1363   :  { %2898 = vmatprep.subr.bf16.mxu1 %v3122_v4 }
0x1428   :  { %v3439_v20 = vpop.f32.mrb[10].mxu1 }
0x1429   :  { %v2659_v21 = vpop.f32.mrb[11].mxu1 }
0x1430   :  { %v1286_v14 = vpop.f32.mrb[12].mxu1 }
0x1431   :  { %v1291_v23 = vrot.slane %v1286_v14, 4  ;;  %v2681_v24 = vpop.f32.mrb[13].mxu1 }
0x1433   :  { %v1293_v25 = vadd.f32 %v1291_v23, %v3405_v45 }
0x1435   :  { %3034 = vtanh.f32 %v1293_v25  ;;  %v2404_v28 = vmul.f32 -1.442695, %v1293_v25 }
0x1437   :  { %3036 = vpow2.f32 %v2404_v28 }
0x143f   :  { %v3035_v26 = vpop.eup %3034 }
0x1440   :  { %1306 = vrot.lane.b32.xlu0 %v3035_v26, %s3125_s16 }
0x1441   :  { %v3037_v30 = vpop.eup %3036 }
0x1442   :  { %v1297_v31 = vadd.f32 1.0, %v3037_v30 }
0x1444   :  { %3038 = vrcp.f32 %v1297_v31 }
0x144e   :  { %v3039_v32 = vpop.eup %3038 }
0x144f   :  { %v1304_v38 = vmul.f32 %v3039_v32, %v1302_v36 }
0x14b2   :  { %v1307_v34 = vpop.permute.xlu0 %1306 }
0x14b3   :  { %v1309_v35 = vmul.f32 %v3039_v32, %v1307_v34 }
0x14b5   :  { %1311 = vrot.lane.b32.xlu1 %v1309_v35, %s3126_s3 }
0x1527   :  { %v1312_v39 = vpop.permute.xlu1 %1311 }
0x1528   :  { %v1314_v40 = vadd.f32 %v1312_v39, %v1304_v38 }
0x152a   :  { %3040 = vtanh.f32 %v1314_v40  ;;  %v1413_v59 = vrot.slane %v1314_v40, 2 }
0x1534   :  { %v3041_v41 = vpop.eup %3040 }
0x1535   :  { %1317 = vrot.lane.b32.xlu0 %v3041_v41, %s3125_s16 }
0x15a7   :  { %v1318_v42 = vpop.permute.xlu0 %1317 }
0x15a8   :  { %v3445_v47 = vmul.f32 %v3039_v32, %v1318_v42 }
0x15aa   :  { %v1326_v22 = vrot.slane %v3445_v47, 4 }
0x15ac   :  { %1327 = vrot.lane.b32.xlu1 %v1326_v22, %s3126_s3 }
0x161e   :  { %v1328_v48 = vpop.permute.xlu1 %1327 }
0x161f   :  { %2691 = vmatmul.mubr.msk.f32.vlgmr.msra.gmra.mrb[10].mxu0 %vm61_vm0, %v1328_v48 }
0x1620   :  { %2894 = vmatpush3.bf16.msra.mxu0 %v3378_v33  ;;  %2712 = vmatprep.mubr.msk.f32.mxu0 %vm3123_vm1, %v3124_v13 }
0x1621   :  { %2895 = vmatprep.subr.bf16.mxu0 %v3122_v4 }
0x1624   :  { %2897 = vmatpush3.bf16.msra.mxu0 %v3388_v37 }
0x1625   :  { %2904 = vmatprep.subr.bf16.mxu0 %v3122_v4 }
0x16f2   :  { %v1397_v50 = vpop.f32.mrb[10].mxu0 }
0x16f3   :  { %v1402_v51 = vrot.slane %v1397_v50, 6  ;;  %v2692_v52 = vpop.f32.mrb[11].mxu0 }
0x16f5   :  { %v1404_v53 = vadd.f32 %v1402_v51, %v3405_v45 }
0x16f7   :  { %3042 = vtanh.f32 %v1404_v53  ;;  %v2406_v55 = vmul.f32 -1.442695, %v1404_v53 }
0x16f9   :  { %3044 = vpow2.f32 %v2406_v55 }
0x1701   :  { %v3043_v54 = vpop.eup %3042 }
0x1702   :  { %1417 = vrot.lane.b32.xlu0 %v3043_v54, %s3125_s16 }
0x1703   :  { %v3045_v43 = vpop.eup %3044 }
0x1704   :  { %v1408_v44 = vadd.f32 1.0, %v3045_v43 }
0x1706   :  { %3046 = vrcp.f32 %v1408_v44 }
0x1710   :  { %v3047_v56 = vpop.eup %3046 }
0x1711   :  { %v1415_v60 = vmul.f32 %v3047_v56, %v1413_v59 }
0x1774   :  { %v1418_v57 = vpop.permute.xlu0 %1417 }
0x1775   :  { %v1420_v58 = vmul.f32 %v3047_v56, %v1418_v57 }
0x1777   :  { %1422 = vrot.lane.b32.xlu1 %v1420_v58, %s3126_s3 }
0x17e9   :  { %v1423_v61 = vpop.permute.xlu1 %1422 }
0x17ea   :  { %v1425_v62 = vadd.f32 %v1423_v61, %v1415_v60 }
0x17ec   :  { %3048 = vtanh.f32 %v1425_v62  ;;  %v1521_v23 = vrot.slane %v1425_v62, 2 }
0x17f6   :  { %v3049_v63 = vpop.eup %3048 }
0x17f7   :  { %1428 = vrot.lane.b32.xlu0 %v3049_v63, %s3125_s16 }
0x1869   :  { %v1429_v0 = vpop.permute.xlu0 %1428 }
0x186a   :  { %v3460_v3 = vmul.f32 %v3047_v56, %v1429_v0 }
0x186c   :  { %v1437_v5 = vrot.slane %v3460_v3, 2 }
0x186e   :  { %1438 = vrot.lane.b32.xlu1 %v1437_v5, %s3126_s3 }
0x18e0   :  { %v1439_v6 = vpop.permute.xlu1 %1438 }
0x18e1   :  { %2702 = vmatmul.mubr.msk.f32.vlgmr.msra.gmra.mrb[14].mxu1 %vm61_vm0, %v1439_v6 }
0x18e2   :  { %2900 = vmatpush3.bf16.msra.mxu1 %v3378_v33  ;;  %2723 = vmatprep.mubr.msk.f32.mxu1 %vm3123_vm1, %v3124_v13 }
0x18e3   :  { %2901 = vmatprep.subr.bf16.mxu1 %v3122_v4 }
0x18e6   :  { %2903 = vmatpush3.bf16.msra.mxu1 %v3388_v37 }
0x18e7   :  { %2910 = vmatprep.subr.bf16.mxu1 %v3122_v4 }
0x19b4   :  { %v1508_v7 = vpop.f32.mrb[14].mxu1 }
0x19b5   :  { %v1512_v9 = vadd.f32 %v1508_v7, %v3405_v45  ;;  %v2703_v10 = vpop.f32.mrb[15].mxu1 }
0x19b7   :  { %3050 = vtanh.f32 %v1512_v9  ;;  %v2408_v15 = vmul.f32 -1.442695, %v1512_v9 }
0x19b9   :  { %3052 = vpow2.f32 %v2408_v15 }
0x19c1   :  { %v3051_v12 = vpop.eup %3050 }
0x19c2   :  { %1525 = vrot.lane.b32.xlu0 %v3051_v12, %s3125_s16 }
0x19c3   :  { %v3053_v8 = vpop.eup %3052 }
0x19c4   :  { %v1516_v17 = vadd.f32 1.0, %v3053_v8 }
0x19c6   :  { %3054 = vrcp.f32 %v1516_v17 }
0x19d0   :  { %v3055_v18 = vpop.eup %3054 }
0x19d1   :  { %v1523_v24 = vmul.f32 %v3055_v18, %v1521_v23 }
0x1a34   :  { %v1526_v21 = vpop.permute.xlu0 %1525 }
0x1a35   :  { %v1528_v14 = vmul.f32 %v3055_v18, %v1526_v21 }
0x1a37   :  { %1530 = vrot.lane.b32.xlu1 %v1528_v14, %s3126_s3 }
0x1aa9   :  { %v1531_v25 = vpop.permute.xlu1 %1530 }
0x1aaa   :  { %v1533_v26 = vadd.f32 %v1531_v25, %v1523_v24 }
0x1aac   :  { %3056 = vtanh.f32 %v1533_v26  ;;  %v1629_v50 = vrot.slane %v1533_v26, 2 }
0x1ab6   :  { %v3057_v45 = vpop.eup %3056 }
0x1ab7   :  { %1536 = vrot.lane.b32.xlu0 %v3057_v45, %s3125_s16 }
0x1b29   :  { %v1537_v28 = vpop.permute.xlu0 %1536 }
0x1b2a   :  { %v1539_v30 = vmul.f32 %v3055_v18, %v1537_v28 }
0x1b2c   :  { %1541 = vrot.lane.b32.xlu1 %v1539_v30, %s3126_s3 }
0x1b9e   :  { %v1542_v31 = vpop.permute.xlu1 %1541 }
0x1b9f   :  { %1544 = vst.msk [vmem:[#allocation3 + $0x8] sm:$0x3] %vm335_vm2, %v1542_v31  ;;  %2713 = vmatmul.mubr.msk.f32.vlgmr.msra.gmra.mrb[12].mxu0 %vm61_vm0, %v1542_v31 }
0x1ba0   :  { %2906 = vmatpush3.bf16.msra.mxu0 %v3378_v33  ;;  %2734 = vmatprep.mubr.msk.f32.mxu0 %vm3123_vm1, %v3124_v13 }
0x1ba1   :  { %2907 = vmatprep.subr.bf16.mxu0 %v3122_v4 }
0x1ba4   :  { %2909 = vmatpush3.bf16.msra.mxu0 %v3388_v37 }
0x1c72   :  { %v1613_v32 = vpop.f32.mrb[12].mxu0 }
0x1c73   :  { %v1618_v34 = vrot.slane %v1613_v32, 2  ;;  %v2714_v35 = vpop.f32.mrb[13].mxu0 }
0x1c75   :  { %v1620_v36 = vadd.f32 %v1618_v34, %v3296_v46 }
0x1c77   :  { %3058 = vtanh.f32 %v1620_v36  ;;  %v2410_v39 = vmul.f32 -1.442695, %v1620_v36 }
0x1c79   :  { %3060 = vpow2.f32 %v2410_v39 }
0x1c81   :  { %v3059_v38 = vpop.eup %3058 }
0x1c82   :  { %1633 = vrot.lane.b32.xlu0 %v3059_v38, %s3125_s16  ;;  %v1073_v38 = vrot.slane %v3439_v20, 2 }
0x1c83   :  { %v3061_v40 = vpop.eup %3060 }
0x1c84   :  { %v1624_v41 = vadd.f32 1.0, %v3061_v40  ;;  %v1075_v39 = vadd.f32 %v1073_v38, %v3259_v19 }
0x1c86   :  { %3062 = vrcp.f32 %v1624_v41 }
0x1c90   :  { %v3063_v42 = vpop.eup %3062 }
0x1c91   :  { %v1631_v51 = vmul.f32 %v3063_v42, %v1629_v50 }
0x1cf4   :  { %v1634_v22 = vpop.permute.xlu0 %1633 }
0x1cf5   :  { %v1636_v48 = vmul.f32 %v3063_v42, %v1634_v22 }
0x1cf7   :  { %1638 = vrot.lane.b32.xlu1 %v1636_v48, %s3126_s3  ;;  %v2401_v48 = vmul.f32 -1.442695, %v1075_v39 }
0x1d69   :  { %v1639_v52 = vpop.permute.xlu1 %1638 }
0x1d6a   :  { %v1641_v53 = vadd.f32 %v1639_v52, %v1631_v51 }
0x1d6c   :  { %3064 = vtanh.f32 %v1641_v53 }
0x1d76   :  { %v3065_v54 = vpop.eup %3064 }
0x1d77   :  { %1644 = vrot.lane.b32.xlu0 %v3065_v54, %s3125_s16  ;;  %v1084_v54 = vrot.slane %v3412_v2, 6 }
0x1de9   :  { %v1645_v55 = vpop.permute.xlu0 %1644 }
0x1dea   :  { %v3487_v43 = vmul.f32 %v3063_v42, %v1645_v55 }
0x1dec   :  { %v1653_v44 = vrot.slane %v3487_v43, 6 }
0x1dee   :  { %1654 = vrot.lane.b32.xlu1 %v1653_v44, %s3126_s3 }
0x1e60   :  { %v1655_v56 = vpop.permute.xlu1 %1654 }
0x1e61   :  { %2724 = vmatmul.mubr.msk.f32.vlgmr.msra.gmra.mrb[16].mxu1 %vm61_vm0, %v1655_v56 }
0x1e62   :  { %2912 = vmatpush3.bf16.msra.mxu1 %v3378_v33  ;;  %2745 = vmatprep.mubr.msk.f32.mxu1 %vm3123_vm1, %v3124_v13 }
0x1e63   :  { %2913 = vmatprep.subr.bf16.mxu1 %v3122_v4  ;;  %v1740_v4 = vrot.slane %v1641_v53, 2 }
0x1e66   :  { %2915 = vmatpush3.bf16.msra.mxu1 %v3388_v37 }
0x1f34   :  { %v1724_v57 = vpop.f32.mrb[16].mxu1 }
0x1f35   :  { %v1729_v58 = vrot.slane %v1724_v57, 4  ;;  %v2725_v59 = vpop.f32.mrb[17].mxu1 }
0x1f37   :  { %v1731_v60 = vadd.f32 %v1729_v58, %v3296_v46 }
0x1f39   :  { %3066 = vtanh.f32 %v1731_v60  ;;  %v2412_v62 = vmul.f32 -1.442695, %v1731_v60 }
0x1f3b   :  { %3068 = vpow2.f32 %v2412_v62 }
0x1f43   :  { %v3067_v61 = vpop.eup %3066 }
0x1f44   :  { %1744 = vrot.lane.b32.xlu0 %v3067_v61, %s3125_s16 }
0x1f45   :  { %v3069_v63 = vpop.eup %3068 }
0x1f46   :  { %v1735_v33 = vadd.f32 1.0, %v3069_v63 }
0x1f48   :  { %3070 = vrcp.f32 %v1735_v33 }
0x1f52   :  { %v3071_v0 = vpop.eup %3070 }
0x1f53   :  { %v1742_v37 = vmul.f32 %v3071_v0, %v1740_v4 }
0x1fb6   :  { %v1745_v13 = vpop.permute.xlu0 %1744 }
0x1fb7   :  { %v1747_v5 = vmul.f32 %v3071_v0, %v1745_v13 }
0x1fb9   :  { %1749 = vrot.lane.b32.xlu1 %v1747_v5, %s3126_s3 }
0x202b   :  { %v1750_v6 = vpop.permute.xlu1 %1749 }
0x202c   :  { %v1752_v7 = vadd.f32 %v1750_v6, %v1742_v37 }
0x202e   :  { %3072 = vtanh.f32 %v1752_v7  ;;  %v1851_v31 = vrot.slane %v1752_v7, 2 }
0x2038   :  { %v3073_v9 = vpop.eup %3072 }
0x2039   :  { %1755 = vrot.lane.b32.xlu0 %v3073_v9, %s3125_s16 }
0x20ab   :  { %v1756_v10 = vpop.permute.xlu0 %1755 }
0x20ac   :  { %v1758_v12 = vmul.f32 %v3071_v0, %v1756_v10 }
0x20ae   :  { %v1764_v15 = vrot.slane %v1758_v12, 4 }
0x20b0   :  { %1765 = vrot.lane.b32.xlu1 %v1764_v15, %s3126_s3  ;;  %v1985_v15 = vld [vmem:[%s3652_s7] sm:$0xff] }
0x2122   :  { %v1766_v8 = vpop.permute.xlu1 %1765 }
0x2123   :  { %2735 = vmatmul.mubr.msk.f32.vlgmr.msra.gmra.mrb[14].mxu0 %vm61_vm0, %v1766_v8  ;;  %v1986_v8 = vld [vmem:[%s3652_s7 + $0x8] sm:$0xff] }
0x21f6   :  { %v1835_v17 = vpop.f32.mrb[14].mxu0 }
0x21f7   :  { %v1840_v18 = vrot.slane %v1835_v17, 6  ;;  %v2736_v21 = vpop.f32.mrb[15].mxu0 }
0x21f9   :  { %v1842_v14 = vadd.f32 %v1840_v18, %v3296_v46  ;;  %v2924_v18 = vpack.c.bf16 %v1986_v8, %v1985_v15 }
0x21fb   :  { %3074 = vtanh.f32 %v1842_v14  ;;  %v2414_v24 = vmul.f32 -1.442695, %v1842_v14 }
0x21fd   :  { %3076 = vpow2.f32 %v2414_v24  ;;  %v2168_v24 = vld [vmem:[%s3655_s10] sm:$0xff] }
0x2205   :  { %v3075_v23 = vpop.eup %3074 }
0x2206   :  { %1855 = vrot.lane.b32.xlu0 %v3075_v23, %s3125_s16 }
0x2207   :  { %v3077_v25 = vpop.eup %3076 }
0x2208   :  { %v1846_v26 = vadd.f32 1.0, %v3077_v25  ;;  %v2169_v25 = vld [vmem:[%s3655_s10 + $0x8] sm:$0xff] }
0x220a   :  { %3078 = vrcp.f32 %v1846_v26  ;;  %v2170_v26 = vld [vmem:[%s3655_s10 + $0x10] sm:$0xff] }
0x2214   :  { %v3079_v45 = vpop.eup %3078 }
0x2215   :  { %v1853_v32 = vmul.f32 %v3079_v45, %v1851_v31  ;;  %v2172_v31 = vld [vmem:[%s3655_s10 + $0x20] sm:$0xff] }
0x2278   :  { %v1856_v28 = vpop.permute.xlu0 %1855 }
0x2279   :  { %v1858_v30 = vmul.f32 %v3079_v45, %v1856_v28 }
0x227b   :  { %1860 = vrot.lane.b32.xlu1 %v1858_v30, %s3126_s3 }
0x22ed   :  { %v1861_v34 = vpop.permute.xlu1 %1860 }
0x22ee   :  { %v1863_v35 = vadd.f32 %v1861_v34, %v1853_v32  ;;  %v2173_v32 = vld [vmem:[%s3655_s10 + $0x28] sm:$0xff] }
0x22f0   :  { %3080 = vtanh.f32 %v1863_v35  ;;  %v1959_v4 = vrot.slane %v1863_v35, 2 }
0x22f1   :  { %3082 = vtanh.f32 %v1075_v39 }
0x22f2   :  { %3084 = vpow2.f32 %v2401_v48 }
0x22fa   :  { %v3081_v36 = vpop.eup %3080 }
0x22fb   :  { %1866 = vrot.lane.b32.xlu0 %v3081_v36, %s3125_s16  ;;  %v3083_v22 = vpop.eup %3082 }
0x22fc   :  { %v3085_v50 = vpop.eup %3084 }
0x22fd   :  { %v1079_v51 = vadd.f32 1.0, %v3085_v50 }
0x22ff   :  { %3086 = vrcp.f32 %v1079_v51 }
0x2309   :  { %v3087_v20 = vpop.eup %3086 }
0x230a   :  { %v1086_v55 = vmul.f32 %v3087_v20, %v1084_v54 }
0x236d   :  { %v1867_v40 = vpop.permute.xlu0 %1866 }
0x236e   :  { %v1869_v41 = vmul.f32 %v3079_v45, %v1867_v40  ;;  %v2932_v45 = vpack.c.bf16 %v2169_v25, %v2168_v24  ;;  %v1987_v40 = vld [vmem:[%s3652_s7 + $0x10] sm:$0xff] }
0x2370   :  { %v1875_v42 = vrot.slane %v1869_v41, 2  ;;  %2933 = vmatprep.subr.bf16.mxu1 %v2932_v45 }
0x2372   :  { %1876 = vrot.lane.b32.xlu1 %v1875_v42, %s3126_s3 }
0x2376   :  { %1088 = vrot.lane.b32.xlu1 %v3083_v22, %s3125_s16 }
0x23e4   :  { %v1877_v52 = vpop.permute.xlu1 %1876 }
0x23e5   :  { %2746 = vmatmul.mubr.msk.f32.vlgmr.msra.gmra.mrb[18].mxu1 %vm61_vm0, %v1877_v52 }
0x23e6   :  { %2935 = vmatpush3.bf16.msra.mxu1 %v2932_v45 }
0x23e8   :  { %v1089_v53 = vpop.permute.xlu1 %1088 }
0x23e9   :  { %v1091_v19 = vmul.f32 %v3087_v20, %v1089_v53  ;;  %v2174_v53 = vld [vmem:[%s3655_s10 + $0x30] sm:$0xff] }
0x23eb   :  { %1093 = vrot.lane.b32.xlu1 %v1091_v19, %s3126_s3  ;;  %v2175_v19 = vld [vmem:[%s3655_s10 + $0x38] sm:$0xff] }
0x23ec   :  { %v2944_v54 = vpack.c.bf16 %v2175_v19, %v2174_v53 }
0x245d   :  { %v1094_v44 = vpop.permute.xlu1 %1093 }
0x245e   :  { %v1096_v56 = vadd.f32 %v1094_v44, %v1086_v55  ;;  %v2267_v55 = vld [vmem:[%s3657_s12] sm:$0xff]  ;;  %v2268_v44 = vld [vmem:[%s3657_s12 + $0x8] sm:$0xff] }
0x2460   :  { %3088 = vtanh.f32 %v1096_v56  ;;  %v2269_v56 = vld [vmem:[%s3657_s12 + $0x10] sm:$0xff] }
0x246a   :  { %v3089_v57 = vpop.eup %3088 }
0x246b   :  { %1099 = vrot.lane.b32.xlu1 %v3089_v57, %s3125_s16  ;;  %v2948_v57 = vpack.c.bf16 %v2268_v44, %v2267_v55 }
0x246f   :  { %1760 = vrot.lane.b32.xlu1 %v1758_v12, %s3126_s3 }
0x2473   :  { %1322 = vrot.lane.b32.xlu1 %v3445_v47, %s3126_s3 }
0x24b8   :  { %v1946_v58 = vpop.f32.mrb[18].mxu1 }
0x24b9   :  { %v1950_v59 = vadd.f32 %v1946_v58, %v3296_v46  ;;  %v2747_v60 = vpop.f32.mrb[19].mxu1  ;;  %v2270_v58 = vld [vmem:[%s3657_s12 + $0x18] sm:$0xff] }
0x24ba   :  { %v2421_v60 = vld [vmem:[%s3654_s9] ss:$0 sm:$0xff] }
0x24bb   :  { %3090 = vtanh.f32 %v1950_v59  ;;  %v2416_v33 = vmul.f32 -1.442695, %v1950_v59  ;;  %v2952_v59 = vpack.c.bf16 %v2270_v58, %v2269_v56 }
0x24bd   :  { %3092 = vpow2.f32 %v2416_v33 }
0x24c5   :  { %v3091_v61 = vpop.eup %3090 }
0x24c6   :  { %1963 = vrot.lane.b32.xlu0 %v3091_v61, %s3125_s16 }
0x24c7   :  { %v3093_v0 = vpop.eup %3092 }
0x24c8   :  { %v1954_v47 = vadd.f32 1.0, %v3093_v0 }
0x24ca   :  { %3094 = vrcp.f32 %v1954_v47  ;;  %v2271_v47 = vld [vmem:[%s3657_s12 + $0x20] sm:$0xff] }
0x24d4   :  { %v3095_v13 = vpop.eup %3094 }
0x24d5   :  { %v1961_v37 = vmul.f32 %v3095_v13, %v1959_v4 }
0x24dd   :  { %v1100_v2 = vpop.permute.xlu1 %1099 }
0x24de   :  { %v1102_v10 = vmul.f32 %v3087_v20, %v1100_v2 }
0x24e1   :  { %v1761_v62 = vpop.permute.xlu1 %1760 }
0x24e2   :  { %1763 = vst.msk [vmem:[#allocation3] sm:$0x30] %vm556_vm3, %v1761_v62 }
0x24e5   :  { %v1323_v63 = vpop.permute.xlu1 %1322 }
0x24e6   :  { %1325 = vst.msk [vmem:[#allocation3 + $0x8] sm:$0x30] %vm556_vm3, %v1323_v63 }
0x2538   :  { %v1964_v46 = vpop.permute.xlu0 %1963 }
0x2539   :  { %v1966_v5 = vmul.f32 %v3095_v13, %v1964_v46 }
0x253b   :  { %1968 = vrot.lane.b32.xlu0 %v1966_v5, %s3126_s3  ;;  %v2422_v5 = vld [vmem:[%s3656_s11] ss:$0 sm:$0xff] }
0x25ad   :  { %v1969_v6 = vpop.permute.xlu0 %1968 }
0x25ae   :  { %v1971_v7 = vadd.f32 %v1969_v6, %v1961_v37 }
0x25b0   :  { %3096 = vtanh.f32 %v1971_v7 }
0x25ba   :  { %v3097_v9 = vpop.eup %3096 }
0x25bb   :  { %1974 = vrot.lane.b32.xlu0 %v3097_v9, %s3125_s16 }
0x25bf   :  { %1649 = vrot.lane.b32.xlu0 %v3487_v43, %s3126_s3  ;;  %v1991_v43 = vld [vmem:[%s3653_s8] sm:$0xff] }
0x25c3   :  { %1871 = vrot.lane.b32.xlu0 %v1869_v41, %s3126_s3  ;;  %v1988_v41 = vld [vmem:[%s3652_s7 + $0x18] sm:$0xff] }
0x25c4   :  { %v2928_v48 = vpack.c.bf16 %v1988_v41, %v1987_v40 }
0x25c7   :  { %1211 = vrot.lane.b32.xlu0 %v3421_v16, %s3126_s3  ;;  %v1992_v16 = vld [vmem:[%s3653_s8 + $0x8] sm:$0xff] }
0x25c8   :  { %v2916_v12 = vpack.c.bf16 %v1992_v16, %v1991_v43  ;;  %v2425_v43 = vld [vmem:[%s3658_s13] ss:$0 sm:$0xff] }
0x25ca   :  { %2917 = vmatprep.subr.bf16.mxu0 %v2916_v12 }
0x25cb   :  { %1433 = vrot.lane.b32.xlu0 %v3460_v3, %s3126_s3  ;;  %2919 = vmatpush3.bf16.msra.mxu0 %v2916_v12 }
0x25cf   :  { %553 = vrot.lane.b32.xlu0 %v3325_v27, %s3126_s3  ;;  %v1993_v27 = vld [vmem:[%s3653_s8 + $0x10] sm:$0xff] }
0x25d3   :  { %882 = vrot.lane.b32.xlu0 %v3368_v29, %s3126_s3  ;;  %v1994_v29 = vld [vmem:[%s3653_s8 + $0x18] sm:$0xff] }
0x25d4   :  { %v2920_v3 = vpack.c.bf16 %v1994_v29, %v1993_v27 }
0x25d6   :  { %2921 = vmatprep.subr.bf16.mxu0 %v2920_v3 }
0x25d7   :  { %1104 = vrot.lane.b32.xlu0 %v1102_v10, %s3126_s3  ;;  %2923 = vmatpush3.bf16.msra.mxu0 %v2920_v3 }
0x25d8   :  { %2925 = vmatprep.subr.bf16.mxu0 %v2924_v18 }
0x262d   :  { %v1975_v17 = vpop.permute.xlu0 %1974 }
0x262e   :  { %v1977_v21 = vmul.f32 %v3095_v13, %v1975_v17  ;;  %v2272_v13 = vld [vmem:[%s3657_s12 + $0x28] sm:$0xff]  ;;  %s3127_s12 = smov [#allocation4]  }
0x262f   :  { %v2956_v46 = vpack.c.bf16 %v2272_v13, %v2271_v47  ;;  %s2370_s5 = sshll.u32 %s3127_s12, 4  ;;  %s2371_s5 = int_to_ptr.vmem [resolvable:$true] %s2370_s5 }
0x2630   :  { %1979 = vrot.lane.b32.xlu1 %v1977_v21, %s3126_s3  ;;  %s3098_s11 = scalar_lea.vmem %s2371_s5, 256  ;;  %p3103_p1 = scmp.lt.s32.totalorder %s2371_s5, %s2371_s5 }
0x2631   :  { %v1650_v14 = vpop.permute.xlu0 %1649  ;;  %p3099_p0 = scmp.ne.s32.totalorder %s2371_s5, %s3098_s11  ;;  %p3104_p2 = scmp.lt.s32.totalorder %s3098_s11, %s3098_s11 }
0x2632   :  { %1652 = vst.msk [vmem:[#allocation3] sm:$0xc0] %vm668_vm4, %v1650_v14 }
0x2633   :  { %p3105_p3 = por %p3104_p2, %p3103_p1 }
0x2634   :  { %441 = vrot.lane.b32.xlu1 %v3310_v1, %s3126_s3  ;;  %v2171_v1 = vld [vmem:[%s3655_s10 + $0x18] sm:$0xff] }
0x2635   :  { %v1872_v23 = vpop.permute.xlu0 %1871  ;;  %v2936_v30 = vpack.c.bf16 %v2171_v1, %v2170_v26  ;;  %p3106_p4 = pnand %p3105_p3, %p3099_p0 }
0x2636   :  { %1874 = vst.msk [vmem:[#allocation3] sm:$0xc] %vm444_vm5, %v1872_v23 }
0x2637   :  { %2937 = vmatprep.subr.bf16.mxu1 %v2936_v30 }
0x2638   :  { %665 = vrot.lane.b32.xlu1 %v3340_v49, %s3126_s3  ;;  %v2940_v49 = vpack.c.bf16 %v2173_v32, %v2172_v31  ;;  %2939 = vmatpush3.bf16.msra.mxu1 %v2936_v30 }
0x2639   :  { %v1212_v28 = vpop.permute.xlu0 %1211 }
0x263a   :  { %1214 = vst.msk [vmem:[#allocation3 + $0x8] sm:$0xc0] %vm668_vm4, %v1212_v28  ;;  %2941 = vmatprep.subr.bf16.mxu1 %v2940_v49 }
0x263c   :  { %993 = vrot.lane.b32.xlu1 %v3417_v11, %s3126_s3  ;;  %2943 = vmatpush3.bf16.msra.mxu1 %v2940_v49 }
0x263d   :  { %v1434_v34 = vpop.permute.xlu0 %1433  ;;  %2945 = vmatprep.subr.bf16.mxu1 %v2944_v54 }
0x263e   :  { %1436 = vst.msk [vmem:[#allocation3 + $0x8] sm:$0xc] %vm444_vm5, %v1434_v34 }
0x2640   :  { %2947 = vmatpush3.bf16.msra.mxu1 %v2944_v54 }
0x2641   :  { %v554_v35 = vpop.permute.xlu0 %553 }
0x2642   :  { %557 = vst.msk [vmem:[#allocation2] sm:$0x30] %vm556_vm3, %v554_v35 }
0x2645   :  { %v883_v36 = vpop.permute.xlu0 %882  ;;  %v1990_v50 = vld [vmem:[#allocation3 + $0x8] sm:$0xff] }
0x2646   :  { %885 = vst.msk [vmem:[#allocation2 + $0x8] sm:$0xc] %vm444_vm5, %v883_v36 }
0x2649   :  { %v1105_v38 = vpop.permute.xlu0 %1104 }
0x264a   :  { %1107 = vst.msk [vmem:[#allocation2 + $0x8] sm:$0xc0] %vm668_vm4, %v1105_v38 }
0x26a2   :  { %v1980_v39 = vpop.permute.xlu1 %1979 }
0x26a3   :  { %1982 = vst.msk [vmem:[#allocation3] sm:$0x3] %vm335_vm2, %v1980_v39 }
0x26a6   :  { %v442_v11 = vpop.permute.xlu1 %441 }
0x26a7   :  { %445 = vst.msk [vmem:[#allocation2] sm:$0xc] %vm444_vm5, %v442_v11 }
0x26aa   :  { %v666_v42 = vpop.permute.xlu1 %665  ;;  %v1989_v22 = vld [vmem:[#allocation3] sm:$0xff] }
0x26ab   :  { %669 = vst.msk [vmem:[#allocation2] sm:$0xc0] %vm668_vm4, %v666_v42  ;;  %2756 = vmatprep.mubr.msk.f32.mxu0 %vm61_vm0, %v1989_v22 }
0x26ac   :  { %2757 = vmatmul.mubr.msk.f32.vlgmr.msra.gmra.mrb[16].mxu0 %vm61_vm0, %v1990_v50 }
0x26ad   :  { %2927 = vmatpush3.bf16.msra.mxu0 %v2924_v18 }
0x26ae   :  { %v994_v51 = vpop.permute.xlu1 %993  ;;  %2929 = vmatprep.subr.bf16.mxu0 %v2928_v48 }
0x26af   :  { %996 = vst.msk [vmem:[#allocation2 + $0x8] sm:$0x30] %vm556_vm3, %v994_v51 }
0x26b1   :  { %2931 = vmatpush3.bf16.msra.mxu0 %v2928_v48 }
0x26b2   :  { %v1983_v52 = vld [vmem:[#allocation2] sm:$0xff]  ;;  %2949 = vmatprep.subr.bf16.mxu0 %v2948_v57 }
0x26b3   :  { %2767 = vmatprep.mubr.msk.f32.mxu0 %vm61_vm0, %v1983_v52 }
0x26b6   :  { %v1984_v20 = vld [vmem:[#allocation2 + $0x8] sm:$0xff] }
0x26b7   :  { %2768 = vmatmul.mubr.msk.f32.vlgmr.msra.gmra.mrb[16].mxu0 %vm61_vm0, %v1984_v20 }
0x26b8   :  { %2951 = vmatpush3.bf16.msra.mxu0 %v2948_v57 }
0x26b9   :  { %2953 = vmatprep.subr.bf16.mxu0 %v2952_v59 }
0x26bc   :  { %2955 = vmatpush3.bf16.msra.mxu0 %v2952_v59 }
0x26bd   :  { %2957 = vmatprep.subr.bf16.mxu0 %v2956_v46 }
0x26c0   :  { %2959 = vmatpush3.bf16.msra.mxu0 %v2956_v46 }
0x278a   :  { %v2769_v61 = vpop.f32.mrb[16].mxu0 }
0x278b   :  { %v2165_v2 = vadd.f32 %v2769_v61, %v2421_v60  ;;  %v2148_v62 = vpop.f32.mrb[17].mxu0 }
0x278c   :  { %v2164_v63 = vadd.f32 %v2421_v60, %v2148_v62 }
0x278d   :  { %v2167_v0 = vmax.f32 %v2165_v2, 0.0 }
0x278e   :  { %v2166_v33 = vmax.f32 %v2164_v63, 0.0 }
0x2790   :  { %2786 = vmatprep.mubr.msk.f32.mxu1 %vm2183_vm6, %v2166_v33 }
0x2791   :  { %2787 = vmatmul.mubr.msk.f32.vlgmr.msra.gmra.mrb[20].mxu1 %vm2183_vm6, %v2167_v0 }
0x2864   :  { %v2788_v4 = vpop.f32.mrb[20].mxu1 }
0x2865   :  { %v2262_v37 = vadd.f32 %v2788_v4, %v2422_v5  ;;  %v2256_v6 = vpop.f32.mrb[21].mxu1 }
0x2866   :  { %v2257_v7 = vadd.f32 %v2422_v5, %v2256_v6 }
0x2867   :  { %v2266_v10 = vmax.f32 %v2262_v37, 0.0 }
0x2868   :  { %v2265_v9 = vmax.f32 %v2257_v7, 0.0 }
0x286a   :  { %2801 = vmatprep.mubr.msk.f32.mxu0 %vm2280_vm7, %v2265_v9 }
0x286b   :  { %2802 = vmatmul.mubr.msk.f32.vlgmr.msra.gmra.mrb[18].mxu0 %vm2280_vm7, %v2266_v10 }
0x293e   :  { %v2803_v16 = vpop.f32.mrb[18].mxu0 }
0x293f   :  { %v2359_v12 = vadd.f32 %v2803_v16, %v2425_v43  ;;  %v2353_v27 = vpop.f32.mrb[19].mxu0 }
0x2940   :  { %v2354_v29 = vadd.f32 %v2425_v43, %v2353_v27 }
0x2941   :  { %2364 = vst.msk [vmem:[#allocation4 + $0x8] sm:$0xff] %vm2362_vm8, %v2359_v12 }
0x2942   :  { %2363 = vst.msk [vmem:[#allocation4] sm:$0xff] %vm2362_vm8, %v2354_v29 }
0x2943   :  { %3109 = shalt.err (!%p3106_p4)
}
0x2944   :  { %s3110_s13 = scalar_lea.hbm %s3659_s14, 256 }
0x2945   :  { %p3111_p5 = scmp.ne.s32.totalorder %s3659_s14, %s3110_s13  ;;  %p3114_p6 = scmp.lt.u32.totalorder %s3110_s13, %s3659_s14 }
0x2947   :  { %p3116_p7 = pnand %p3114_p6, %p3111_p5 }
0x2949   :  { %3119 = shalt.err (!%p3116_p7)
}
0x294a   :  { %s3128_s18 = smov 128   ;;  %s3129_s19 = smov 8  }
0x294b   :  { %2376 = dma.vmem_to_hbm [thread:$0]  %s2371_s5, 256, %s3659_s14, [#allocation5], %s3128_s18, %s3128_s18, %s3129_s19  }
0x294c   :  { %3120 = dma.done.wait [#allocation5], 256  }
0x294d   :  { %3121 = vsyncadd [#allocation5], 4294967040 }
0x294e   :  { %2380 = vsyncpa [#allocation5], 1 }

</bundles_post_ra>
